<compile_context>
chip_gen: v6e
topology: v6e:2x2x1
jax: 0.10.0
libtpu: 0.0.40
codegen_flags: <defaults>
</compile_context>

<pallas_src>
import functools

import jax
import jax.numpy as jnp
from jax.experimental import pallas as pl
from jax.experimental.pallas import tpu as pltpu


def _round_up(x, m):
    return ((x + m - 1) // m) * m


def _apply_activation(x, activ):
    if activ == 'relu':
        return jnp.maximum(x, 0.0)
    if activ == 'lrelu':
        return jnp.where(x >= 0, x, 0.2 * x)
    if activ == 'tanh':
        return jnp.tanh(x)
    if activ == 'none':
        return x
    # TODO(synk): 'prelu'/'selu' activations not implemented (config uses 'relu').
    raise ValueError(f'Unsupported activation: {activ}')


# ----------------------------------------------------------------------------
# Pallas kernel 1: tiled GEMM + bias + activation (bf16 MXU, f32 accumulate)
# ----------------------------------------------------------------------------
def _gemm_bias_act_kernel(x_ref, w_ref, b_ref, o_ref, acc_ref, *, activ):
    k = pl.program_id(2)

    @pl.when(k == 0)
    def _():
        acc_ref[...] = jnp.zeros_like(acc_ref)

    acc_ref[...] += jnp.dot(x_ref[...], w_ref[...],
                            preferred_element_type=jnp.float32)

    @pl.when(k == pl.num_programs(2) - 1)
    def _():
        out = acc_ref[...] + b_ref[...]       # bias in f32
        out = _apply_activation(out, activ)   # activation in f32
        o_ref[...] = out.astype(o_ref.dtype)


def gemm_bias_act(x, w, b, activ, out_dtype=jnp.float32,
                  tm_max=512, tn_max=256, tk_max=512):
    """Fused (M,K)@(K,N) + bias (+activation) with a real (M,N,K) grid."""
    M, K = x.shape
    K2, N = w.shape
    assert K == K2, (K, K2)

    # Tile sizes: sublane-aligned M, 128-lane-aligned K and N, bounded so the
    # double-buffered working set fits comfortably in v7x's scoped VMEM.
    tm = min(tm_max, _round_up(M, 8))
    tn = min(tn_max, _round_up(N, 128))
    tk = min(tk_max, _round_up(K, 128))
    Mp = _round_up(M, tm)
    Kp = _round_up(K, tk)
    Np = _round_up(N, tn)

    xb = jnp.pad(x.astype(jnp.bfloat16), ((0, Mp - M), (0, Kp - K)))
    wb = jnp.pad(w.astype(jnp.bfloat16), ((0, Kp - K), (0, Np - N)))
    bb = jnp.pad(b.astype(jnp.float32).reshape(1, N), ((0, 0), (0, Np - N)))

    grid = (Mp // tm, Np // tn, Kp // tk)

    out = pl.pallas_call(
        functools.partial(_gemm_bias_act_kernel, activ=activ),
        out_shape=jax.ShapeDtypeStruct((Mp, Np), out_dtype),
        grid_spec=pltpu.PrefetchScalarGridSpec(
            num_scalar_prefetch=0,
            grid=grid,
            in_specs=[
                pl.BlockSpec((tm, tk), lambda i, j, k: (i, k)),
                pl.BlockSpec((tk, tn), lambda i, j, k: (k, j)),
                pl.BlockSpec((1, tn), lambda i, j, k: (0, j)),
            ],
            out_specs=pl.BlockSpec((tm, tn), lambda i, j, k: (i, j)),
            scratch_shapes=[pltpu.VMEM((tm, tn), jnp.float32)],
        ),
        compiler_params=pltpu.CompilerParams(
            dimension_semantics=("parallel", "parallel", "arbitrary"),
            vmem_limit_bytes=32 * 1024 * 1024,
        ),
    )(xb, wb, bb)
    return out[:M, :N]


# ----------------------------------------------------------------------------
# Pallas kernel 2: fused AdaptiveAvgPool2d(1) + 1x1 conv (streamed reduction)
# ----------------------------------------------------------------------------
def _pool_fc_kernel(x_ref, w_ref, b_ref, o_ref, acc_ref, *, inv_hw):
    t = pl.program_id(0)

    @pl.when(t == 0)
    def _():
        acc_ref[...] = jnp.zeros_like(acc_ref)

    # Accumulate spatial sum of this tile: (Bp, thw, Cp) -> (Bp, Cp) in f32.
    acc_ref[...] += jnp.sum(x_ref[...].astype(jnp.float32), axis=1)

    @pl.when(t == pl.num_programs(0) - 1)
    def _():
        pooled = acc_ref[...] * inv_hw                      # mean over true H*W
        out = jnp.dot(pooled, w_ref[...],
                      preferred_element_type=jnp.float32) + b_ref[...]
        o_ref[...] = out.astype(o_ref.dtype)


def pool_fc(x, w, b, thw_max=512):
    """x: (B, HW, C) channels-last; w: (C, S); b: (S,) -> (B, S) f32."""
    B, HW, C = x.shape
    _, S = w.shape

    Bp = _round_up(B, 8)
    Cp = _round_up(C, 128)
    Sp = _round_up(S, 128)
    thw = min(thw_max, _round_up(HW, 8))
    HWp = _round_up(HW, thw)

    xb = jnp.pad(x, ((0, Bp - B), (0, HWp - HW), (0, Cp - C)))
    wb = jnp.pad(w.astype(jnp.float32), ((0, Cp - C), (0, Sp - S)))
    bb = jnp.pad(b.astype(jnp.float32).reshape(1, S), ((0, 0), (0, Sp - S)))

    out = pl.pallas_call(
        functools.partial(_pool_fc_kernel, inv_hw=1.0 / float(HW)),
        out_shape=jax.ShapeDtypeStruct((Bp, Sp), jnp.float32),
        grid_spec=pltpu.PrefetchScalarGridSpec(
            num_scalar_prefetch=0,
            grid=(HWp // thw,),
            in_specs=[
                pl.BlockSpec((Bp, thw, Cp), lambda t: (0, t, 0)),
                pl.BlockSpec((Cp, Sp), lambda t: (0, 0)),
                pl.BlockSpec((1, Sp), lambda t: (0, 0)),
            ],
            out_specs=pl.BlockSpec((Bp, Sp), lambda t: (0, 0)),
            scratch_shapes=[pltpu.VMEM((Bp, Cp), jnp.float32)],
        ),
        compiler_params=pltpu.CompilerParams(
            dimension_semantics=("arbitrary",),
            vmem_limit_bytes=32 * 1024 * 1024,
        ),
    )(xb, wb, bb)
    return out[:B, :S]


# ----------------------------------------------------------------------------
# Glue: reflect padding, NHWC im2col, Conv2dBlock, StyleEncoder forward
# ----------------------------------------------------------------------------
def _pad2d_nhwc(x, pad, pad_type):
    if pad == 0:
        return x
    widths = ((0, 0), (pad, pad), (pad, pad), (0, 0))
    if pad_type == 'reflect':
        return jnp.pad(x, widths, mode='reflect')
    if pad_type == 'replicate':
        return jnp.pad(x, widths, mode='edge')
    if pad_type == 'zero':
        return jnp.pad(x, widths)
    raise ValueError(f'Unsupported padding type: {pad_type}')


def conv2d_block_nhwc(x, w, b, stride, pad, pad_type, activ,
                      out_dtype=jnp.bfloat16):
    """x: (B, H, W, Cin) NHWC; w: (Cout, Cin, kh, kw) torch layout; b: (Cout,)."""
    B, H, W, Cin = x.shape
    Cout, _, kh, kw = w.shape
    xp = _pad2d_nhwc(x, pad, pad_type)
    Hp, Wp = xp.shape[1], xp.shape[2]
    Ho = (Hp - kh) // stride + 1
    Wo = (Wp - kw) // stride + 1

    # im2col with (kh, kw, Cin) column ordering — no activation transpose needed.
    cols = []
    for i in range(kh):
        for j in range(kw):
            cols.append(xp[:, i:i + stride * Ho:stride,
                           j:j + stride * Wo:stride, :])
    cols = jnp.stack(cols, axis=3)                        # (B, Ho, Wo, kh*kw, Cin)
    cols = cols.reshape(B * Ho * Wo, kh * kw * Cin)

    # (Cout, Cin, kh, kw) -> (kh, kw, Cin, Cout) -> (kh*kw*Cin, Cout)
    wmat = jnp.transpose(w, (2, 3, 1, 0)).reshape(kh * kw * Cin, Cout)

    out = gemm_bias_act(cols, wmat, b, activ, out_dtype=out_dtype)
    return out.reshape(B, Ho, Wo, Cout)                   # stays NHWC


def init_style_encoder_params(key, n_downsample, input_dim, dim, style_dim):
    # Layer plan mirrors StyleEncoder.__init__.
    plan = [(input_dim, dim, 7, 1, 3)]
    d = dim
    for _ in range(2):
        plan.append((d, 2 * d, 4, 2, 1))
        d *= 2
    for _ in range(n_downsample - 2):
        plan.append((d, d, 4, 2, 1))

    conv_wb, layer_plan = [], []
    for (cin, cout, k, s, p) in plan:
        key, kw_, kb_ = jax.random.split(key, 3)
        wgt = jax.random.normal(kw_, (cout, cin, k, k), jnp.float32) * 0.05
        bia = jax.random.normal(kb_, (cout,), jnp.float32) * 0.01
        conv_wb.append((wgt, bia))
        layer_plan.append((s, p))

    key, kw_, kb_ = jax.random.split(key, 3)
    w_fc = jax.random.normal(kw_, (style_dim, d, 1, 1), jnp.float32) * 0.05
    b_fc = jax.random.normal(kb_, (style_dim,), jnp.float32) * 0.01
    return conv_wb, (w_fc, b_fc), tuple(layer_plan), d


def style_encoder_forward(x_nchw, conv_wb, fc_params, layer_plan,
                          activ='relu', pad_type='reflect'):
    # Single NCHW -> NHWC conversion at the model boundary; channels-last after.
    x = jnp.transpose(x_nchw, (0, 2, 3, 1))
    for (w, b), (stride, pad) in zip(conv_wb, layer_plan):
        x = conv2d_block_nhwc(x, w, b, stride, pad, pad_type, activ)

    w_fc, b_fc = fc_params
    B, H, Wd, C = x.shape
    S = w_fc.shape[0]
    out = pool_fc(x.reshape(B, H * Wd, C), w_fc.reshape(S, C).T, b_fc)
    return out.reshape(B, S, 1, 1)                        # matches NCHW (B,S,1,1)


# ----------------------------------------------------------------------------
if __name__ == "__main__":
    key = jax.random.PRNGKey(0)
    kx, kp = jax.random.split(key)

    # StyleEncoder(n_downsample=2, input_dim=4, dim=8, style_dim=8,
    #              norm='none', activ='relu', pad_type='reflect')
    n_downsample, input_dim, dim, style_dim = 2, 4, 8, 8

    x = jax.random.normal(kx, (2, input_dim, 16, 16), jnp.float32)
    conv_wb, fc_params, layer_plan, out_dim = init_style_encoder_params(
        kp, n_downsample, input_dim, dim, style_dim)

    fwd = jax.jit(functools.partial(style_encoder_forward,
                                    layer_plan=layer_plan))
    y = fwd(x, conv_wb, fc_params)
    y = jax.block_until_ready(y)

    assert y.shape == (2, style_dim, 1, 1), y.shape
    assert bool(jnp.all(jnp.isfinite(y)))
    print("KERNEL_OK")
</pallas_src>

<mosaic_0001>
module attributes {stable_mosaic.version = 11 : i64} {
  func.func @_gemm_bias_act_kernel(%arg0: i32, %arg1: i32, %arg2: i32, %arg3: memref<512x256xbf16, #tpu.memory_space<vmem>>, %arg4: memref<256x128xbf16, #tpu.memory_space<vmem>>, %arg5: memref<1x128xf32, #tpu.memory_space<vmem>>, %arg6: memref<512x128xbf16, #tpu.memory_space<vmem>>, %arg7: memref<512x128xf32, #tpu.memory_space<vmem>>) attributes {dimension_semantics = [#tpu.dimension_semantics<parallel>, #tpu.dimension_semantics<parallel>, #tpu.dimension_semantics<arbitrary>], iteration_bounds = array<i64: 1, 1, 1>, scalar_prefetch = 0 : i64, scratch_operands = 1 : i64, tpu.core_type = #tpu.core_type<tc>, window_params = [{transform_indices = @transform_0, window_bounds = array<i64: 512, 256>}, {transform_indices = @transform_1, window_bounds = array<i64: 256, 128>}, {transform_indices = @transform_2, window_bounds = array<i64: 1, 128>}, {transform_indices = @transform_3, window_bounds = array<i64: 512, 128>}]} {
    %c0_i32 = arith.constant 0 : i32
    %0 = arith.cmpi eq, %arg2, %c0_i32 : i32
    %1 = arith.extui %0 : i1 to i32
    %c0_i32_0 = arith.constant 0 : i32
    %2 = arith.cmpi ne, %1, %c0_i32_0 : i32
    scf.if %2 {
      %cst_10 = arith.constant 0.000000e+00 : f32
      %12 = vector.broadcast %cst_10 : f32 to vector<512x128xf32>
      %c0_11 = arith.constant 0 : index
      %c0_12 = arith.constant 0 : index
      %13 = vector.load %arg7[%c0_11, %c0_12] : memref<512x128xf32, #tpu.memory_space<vmem>>, vector<512x128xf32>
      tpu.vector_store %arg7[%c0_11, %c0_12], %12 {strides = array<i32>} : memref<512x128xf32, #tpu.memory_space<vmem>>, vector<512x128xf32>,
    } else {
    }
    %c0 = arith.constant 0 : index
    %c0_1 = arith.constant 0 : index
    %3 = vector.load %arg7[%c0, %c0_1] : memref<512x128xf32, #tpu.memory_space<vmem>>, vector<512x128xf32>
    %c0_2 = arith.constant 0 : index
    %c0_3 = arith.constant 0 : index
    %4 = vector.load %arg3[%c0_2, %c0_3] : memref<512x256xbf16, #tpu.memory_space<vmem>>, vector<512x256xbf16>
    %c0_4 = arith.constant 0 : index
    %c0_5 = arith.constant 0 : index
    %5 = vector.load %arg4[%c0_4, %c0_5] : memref<256x128xbf16, #tpu.memory_space<vmem>>, vector<256x128xbf16>
    %cst = arith.constant dense<0.000000e+00> : vector<512x128xf32>
    %6 = tpu.matmul %4, %5, %cst {dimension_numbers = #tpu.dot_dimension_numbers<[1], [0], [0], [1], [0, 0, 1, 1], [], []>} : vector<512x256xbf16>, vector<256x128xbf16>, vector<512x128xf32> -> vector<512x128xf32>
    %7 = arith.addf %3, %6 : vector<512x128xf32>
    %c0_6 = arith.constant 0 : index
    %c0_7 = arith.constant 0 : index
    %8 = vector.load %arg7[%c0_6, %c0_7] : memref<512x128xf32, #tpu.memory_space<vmem>>, vector<512x128xf32>
    tpu.vector_store %arg7[%c0_6, %c0_7], %7 {strides = array<i32>} : memref<512x128xf32, #tpu.memory_space<vmem>>, vector<512x128xf32>,
    %c0_i32_8 = arith.constant 0 : i32
    %9 = arith.cmpi eq, %arg2, %c0_i32_8 : i32
    %10 = arith.extui %9 : i1 to i32
    %c0_i32_9 = arith.constant 0 : i32
    %11 = arith.cmpi ne, %10, %c0_i32_9 : i32
    scf.if %11 {
      %c0_10 = arith.constant 0 : index
      %c0_11 = arith.constant 0 : index
      %12 = vector.load %arg7[%c0_10, %c0_11] : memref<512x128xf32, #tpu.memory_space<vmem>>, vector<512x128xf32>
      %c0_12 = arith.constant 0 : index
      %c0_13 = arith.constant 0 : index
      %13 = vector.load %arg5[%c0_12, %c0_13] : memref<1x128xf32, #tpu.memory_space<vmem>>, vector<1x128xf32>
      %14 = vector.broadcast %13 : vector<1x128xf32> to vector<512x128xf32>
      %15 = arith.addf %12, %14 : vector<512x128xf32>
      %cst_14 = arith.constant 0.000000e+00 : f32
      %16 = vector.broadcast %cst_14 : f32 to vector<512x128xf32>
      %17 = arith.maximumf %15, %16 : vector<512x128xf32>
      %18 = arith.truncf %17 : vector<512x128xf32> to vector<512x128xbf16>
      %c0_15 = arith.constant 0 : index
      %c0_16 = arith.constant 0 : index
      %19 = vector.load %arg6[%c0_15, %c0_16] : memref<512x128xbf16, #tpu.memory_space<vmem>>, vector<512x128xbf16>
      tpu.vector_store %arg6[%c0_15, %c0_16], %18 {strides = array<i32>} : memref<512x128xbf16, #tpu.memory_space<vmem>>, vector<512x128xbf16>,
    } else {
    }
    return
  }
  func.func @transform_0(%arg0: i32, %arg1: i32, %arg2: i32) -> (i32, i32) {
    %c0_i32 = arith.constant 0 : i32
    return %arg0, %arg2 : i32, i32
  }
  func.func @transform_1(%arg0: i32, %arg1: i32, %arg2: i32) -> (i32, i32) {
    %c0_i32 = arith.constant 0 : i32
    return %arg2, %arg1 : i32, i32
  }
  func.func @transform_2(%arg0: i32, %arg1: i32, %arg2: i32) -> (i32, i32) {
    %c0_i32 = arith.constant 0 : i32
    %c0_i32_0 = arith.constant 0 : i32
    return %c0_i32, %arg1 : i32, i32
  }
  func.func @transform_3(%arg0: i32, %arg1: i32, %arg2: i32) -> (i32, i32) {
    %c0_i32 = arith.constant 0 : i32
    return %arg0, %arg1 : i32, i32
  }
}

module attributes {stable_mosaic.version = 11 : i64} {
  func.func @_gemm_bias_act_kernel(%arg0: i32, %arg1: i32, %arg2: i32, %arg3: memref<128x128xbf16, #tpu.memory_space<vmem>>, %arg4: memref<128x128xbf16, #tpu.memory_space<vmem>>, %arg5: memref<1x128xf32, #tpu.memory_space<vmem>>, %arg6: memref<128x128xbf16, #tpu.memory_space<vmem>>, %arg7: memref<128x128xf32, #tpu.memory_space<vmem>>) attributes {dimension_semantics = [#tpu.dimension_semantics<parallel>, #tpu.dimension_semantics<parallel>, #tpu.dimension_semantics<arbitrary>], iteration_bounds = array<i64: 1, 1, 1>, scalar_prefetch = 0 : i64, scratch_operands = 1 : i64, tpu.core_type = #tpu.core_type<tc>, window_params = [{transform_indices = @transform_0, window_bounds = array<i64: 128, 128>}, {transform_indices = @transform_1, window_bounds = array<i64: 128, 128>}, {transform_indices = @transform_2, window_bounds = array<i64: 1, 128>}, {transform_indices = @transform_3, window_bounds = array<i64: 128, 128>}]} {
    %c0_i32 = arith.constant 0 : i32
    %0 = arith.cmpi eq, %arg2, %c0_i32 : i32
    %1 = arith.extui %0 : i1 to i32
    %c0_i32_0 = arith.constant 0 : i32
    %2 = arith.cmpi ne, %1, %c0_i32_0 : i32
    scf.if %2 {
      %cst_10 = arith.constant 0.000000e+00 : f32
      %12 = vector.broadcast %cst_10 : f32 to vector<128x128xf32>
      %c0_11 = arith.constant 0 : index
      %c0_12 = arith.constant 0 : index
      %13 = vector.load %arg7[%c0_11, %c0_12] : memref<128x128xf32, #tpu.memory_space<vmem>>, vector<128x128xf32>
      tpu.vector_store %arg7[%c0_11, %c0_12], %12 {strides = array<i32>} : memref<128x128xf32, #tpu.memory_space<vmem>>, vector<128x128xf32>,
    } else {
    }
    %c0 = arith.constant 0 : index
    %c0_1 = arith.constant 0 : index
    %3 = vector.load %arg7[%c0, %c0_1] : memref<128x128xf32, #tpu.memory_space<vmem>>, vector<128x128xf32>
    %c0_2 = arith.constant 0 : index
    %c0_3 = arith.constant 0 : index
    %4 = vector.load %arg3[%c0_2, %c0_3] : memref<128x128xbf16, #tpu.memory_space<vmem>>, vector<128x128xbf16>
    %c0_4 = arith.constant 0 : index
    %c0_5 = arith.constant 0 : index
    %5 = vector.load %arg4[%c0_4, %c0_5] : memref<128x128xbf16, #tpu.memory_space<vmem>>, vector<128x128xbf16>
    %cst = arith.constant dense<0.000000e+00> : vector<128x128xf32>
    %6 = tpu.matmul %4, %5, %cst {dimension_numbers = #tpu.dot_dimension_numbers<[1], [0], [0], [1], [0, 0, 1, 1], [], []>} : vector<128x128xbf16>, vector<128x128xbf16>, vector<128x128xf32> -> vector<128x128xf32>
    %7 = arith.addf %3, %6 : vector<128x128xf32>
    %c0_6 = arith.constant 0 : index
    %c0_7 = arith.constant 0 : index
    %8 = vector.load %arg7[%c0_6, %c0_7] : memref<128x128xf32, #tpu.memory_space<vmem>>, vector<128x128xf32>
    tpu.vector_store %arg7[%c0_6, %c0_7], %7 {strides = array<i32>} : memref<128x128xf32, #tpu.memory_space<vmem>>, vector<128x128xf32>,
    %c0_i32_8 = arith.constant 0 : i32
    %9 = arith.cmpi eq, %arg2, %c0_i32_8 : i32
    %10 = arith.extui %9 : i1 to i32
    %c0_i32_9 = arith.constant 0 : i32
    %11 = arith.cmpi ne, %10, %c0_i32_9 : i32
    scf.if %11 {
      %c0_10 = arith.constant 0 : index
      %c0_11 = arith.constant 0 : index
      %12 = vector.load %arg7[%c0_10, %c0_11] : memref<128x128xf32, #tpu.memory_space<vmem>>, vector<128x128xf32>
      %c0_12 = arith.constant 0 : index
      %c0_13 = arith.constant 0 : index
      %13 = vector.load %arg5[%c0_12, %c0_13] : memref<1x128xf32, #tpu.memory_space<vmem>>, vector<1x128xf32>
      %14 = vector.broadcast %13 : vector<1x128xf32> to vector<128x128xf32>
      %15 = arith.addf %12, %14 : vector<128x128xf32>
      %cst_14 = arith.constant 0.000000e+00 : f32
      %16 = vector.broadcast %cst_14 : f32 to vector<128x128xf32>
      %17 = arith.maximumf %15, %16 : vector<128x128xf32>
      %18 = arith.truncf %17 : vector<128x128xf32> to vector<128x128xbf16>
      %c0_15 = arith.constant 0 : index
      %c0_16 = arith.constant 0 : index
      %19 = vector.load %arg6[%c0_15, %c0_16] : memref<128x128xbf16, #tpu.memory_space<vmem>>, vector<128x128xbf16>
      tpu.vector_store %arg6[%c0_15, %c0_16], %18 {strides = array<i32>} : memref<128x128xbf16, #tpu.memory_space<vmem>>, vector<128x128xbf16>,
    } else {
    }
    return
  }
  func.func @transform_0(%arg0: i32, %arg1: i32, %arg2: i32) -> (i32, i32) {
    %c0_i32 = arith.constant 0 : i32
    return %arg0, %arg2 : i32, i32
  }
  func.func @transform_1(%arg0: i32, %arg1: i32, %arg2: i32) -> (i32, i32) {
    %c0_i32 = arith.constant 0 : i32
    return %arg2, %arg1 : i32, i32
  }
  func.func @transform_2(%arg0: i32, %arg1: i32, %arg2: i32) -> (i32, i32) {
    %c0_i32 = arith.constant 0 : i32
    %c0_i32_0 = arith.constant 0 : i32
    return %c0_i32, %arg1 : i32, i32
  }
  func.func @transform_3(%arg0: i32, %arg1: i32, %arg2: i32) -> (i32, i32) {
    %c0_i32 = arith.constant 0 : i32
    return %arg0, %arg1 : i32, i32
  }
}

module attributes {stable_mosaic.version = 11 : i64} {
  func.func @_gemm_bias_act_kernel(%arg0: i32, %arg1: i32, %arg2: i32, %arg3: memref<32x256xbf16, #tpu.memory_space<vmem>>, %arg4: memref<256x128xbf16, #tpu.memory_space<vmem>>, %arg5: memref<1x128xf32, #tpu.memory_space<vmem>>, %arg6: memref<32x128xbf16, #tpu.memory_space<vmem>>, %arg7: memref<32x128xf32, #tpu.memory_space<vmem>>) attributes {dimension_semantics = [#tpu.dimension_semantics<parallel>, #tpu.dimension_semantics<parallel>, #tpu.dimension_semantics<arbitrary>], iteration_bounds = array<i64: 1, 1, 1>, scalar_prefetch = 0 : i64, scratch_operands = 1 : i64, tpu.core_type = #tpu.core_type<tc>, window_params = [{transform_indices = @transform_0, window_bounds = array<i64: 32, 256>}, {transform_indices = @transform_1, window_bounds = array<i64: 256, 128>}, {transform_indices = @transform_2, window_bounds = array<i64: 1, 128>}, {transform_indices = @transform_3, window_bounds = array<i64: 32, 128>}]} {
    %c0_i32 = arith.constant 0 : i32
    %0 = arith.cmpi eq, %arg2, %c0_i32 : i32
    %1 = arith.extui %0 : i1 to i32
    %c0_i32_0 = arith.constant 0 : i32
    %2 = arith.cmpi ne, %1, %c0_i32_0 : i32
    scf.if %2 {
      %cst_10 = arith.constant 0.000000e+00 : f32
      %12 = vector.broadcast %cst_10 : f32 to vector<32x128xf32>
      %c0_11 = arith.constant 0 : index
      %c0_12 = arith.constant 0 : index
      %13 = vector.load %arg7[%c0_11, %c0_12] : memref<32x128xf32, #tpu.memory_space<vmem>>, vector<32x128xf32>
      tpu.vector_store %arg7[%c0_11, %c0_12], %12 {strides = array<i32>} : memref<32x128xf32, #tpu.memory_space<vmem>>, vector<32x128xf32>,
    } else {
    }
    %c0 = arith.constant 0 : index
    %c0_1 = arith.constant 0 : index
    %3 = vector.load %arg7[%c0, %c0_1] : memref<32x128xf32, #tpu.memory_space<vmem>>, vector<32x128xf32>
    %c0_2 = arith.constant 0 : index
    %c0_3 = arith.constant 0 : index
    %4 = vector.load %arg3[%c0_2, %c0_3] : memref<32x256xbf16, #tpu.memory_space<vmem>>, vector<32x256xbf16>
    %c0_4 = arith.constant 0 : index
    %c0_5 = arith.constant 0 : index
    %5 = vector.load %arg4[%c0_4, %c0_5] : memref<256x128xbf16, #tpu.memory_space<vmem>>, vector<256x128xbf16>
    %cst = arith.constant dense<0.000000e+00> : vector<32x128xf32>
    %6 = tpu.matmul %4, %5, %cst {dimension_numbers = #tpu.dot_dimension_numbers<[1], [0], [0], [1], [0, 0, 1, 1], [], []>} : vector<32x256xbf16>, vector<256x128xbf16>, vector<32x128xf32> -> vector<32x128xf32>
    %7 = arith.addf %3, %6 : vector<32x128xf32>
    %c0_6 = arith.constant 0 : index
    %c0_7 = arith.constant 0 : index
    %8 = vector.load %arg7[%c0_6, %c0_7] : memref<32x128xf32, #tpu.memory_space<vmem>>, vector<32x128xf32>
    tpu.vector_store %arg7[%c0_6, %c0_7], %7 {strides = array<i32>} : memref<32x128xf32, #tpu.memory_space<vmem>>, vector<32x128xf32>,
    %c0_i32_8 = arith.constant 0 : i32
    %9 = arith.cmpi eq, %arg2, %c0_i32_8 : i32
    %10 = arith.extui %9 : i1 to i32
    %c0_i32_9 = arith.constant 0 : i32
    %11 = arith.cmpi ne, %10, %c0_i32_9 : i32
    scf.if %11 {
      %c0_10 = arith.constant 0 : index
      %c0_11 = arith.constant 0 : index
      %12 = vector.load %arg7[%c0_10, %c0_11] : memref<32x128xf32, #tpu.memory_space<vmem>>, vector<32x128xf32>
      %c0_12 = arith.constant 0 : index
      %c0_13 = arith.constant 0 : index
      %13 = vector.load %arg5[%c0_12, %c0_13] : memref<1x128xf32, #tpu.memory_space<vmem>>, vector<1x128xf32>
      %14 = vector.broadcast %13 : vector<1x128xf32> to vector<32x128xf32>
      %15 = arith.addf %12, %14 : vector<32x128xf32>
      %cst_14 = arith.constant 0.000000e+00 : f32
      %16 = vector.broadcast %cst_14 : f32 to vector<32x128xf32>
      %17 = arith.maximumf %15, %16 : vector<32x128xf32>
      %18 = arith.truncf %17 : vector<32x128xf32> to vector<32x128xbf16>
      %c0_15 = arith.constant 0 : index
      %c0_16 = arith.constant 0 : index
      %19 = vector.load %arg6[%c0_15, %c0_16] : memref<32x128xbf16, #tpu.memory_space<vmem>>, vector<32x128xbf16>
      tpu.vector_store %arg6[%c0_15, %c0_16], %18 {strides = array<i32>} : memref<32x128xbf16, #tpu.memory_space<vmem>>, vector<32x128xbf16>,
    } else {
    }
    return
  }
  func.func @transform_0(%arg0: i32, %arg1: i32, %arg2: i32) -> (i32, i32) {
    %c0_i32 = arith.constant 0 : i32
    return %arg0, %arg2 : i32, i32
  }
  func.func @transform_1(%arg0: i32, %arg1: i32, %arg2: i32) -> (i32, i32) {
    %c0_i32 = arith.constant 0 : i32
    return %arg2, %arg1 : i32, i32
  }
  func.func @transform_2(%arg0: i32, %arg1: i32, %arg2: i32) -> (i32, i32) {
    %c0_i32 = arith.constant 0 : i32
    %c0_i32_0 = arith.constant 0 : i32
    return %c0_i32, %arg1 : i32, i32
  }
  func.func @transform_3(%arg0: i32, %arg1: i32, %arg2: i32) -> (i32, i32) {
    %c0_i32 = arith.constant 0 : i32
    return %arg0, %arg1 : i32, i32
  }
}

module attributes {stable_mosaic.version = 11 : i64} {
  func.func @_pool_fc_kernel(%arg0: i32, %arg1: memref<8x16x128xbf16, #tpu.memory_space<vmem>>, %arg2: memref<128x128xf32, #tpu.memory_space<vmem>>, %arg3: memref<1x128xf32, #tpu.memory_space<vmem>>, %arg4: memref<8x128xf32, #tpu.memory_space<vmem>>, %arg5: memref<8x128xf32, #tpu.memory_space<vmem>>) attributes {dimension_semantics = [#tpu.dimension_semantics<arbitrary>], iteration_bounds = array<i64: 1>, scalar_prefetch = 0 : i64, scratch_operands = 1 : i64, tpu.core_type = #tpu.core_type<tc>, window_params = [{transform_indices = @transform_0, window_bounds = array<i64: 8, 16, 128>}, {pipeline_mode = #tpu.pipeline_mode<synchronous>, transform_indices = @transform_1, window_bounds = array<i64: 128, 128>}, {pipeline_mode = #tpu.pipeline_mode<synchronous>, transform_indices = @transform_2, window_bounds = array<i64: 1, 128>}, {pipeline_mode = #tpu.pipeline_mode<synchronous>, transform_indices = @transform_3, window_bounds = array<i64: 8, 128>}]} {
    %c0_i32 = arith.constant 0 : i32
    %0 = arith.cmpi eq, %arg0, %c0_i32 : i32
    %1 = arith.extui %0 : i1 to i32
    %c0_i32_0 = arith.constant 0 : i32
    %2 = arith.cmpi ne, %1, %c0_i32_0 : i32
    scf.if %2 {
      %cst_9 = arith.constant 0.000000e+00 : f32
      %12 = vector.broadcast %cst_9 : f32 to vector<8x128xf32>
      %c0_10 = arith.constant 0 : index
      %c0_11 = arith.constant 0 : index
      %13 = vector.load %arg5[%c0_10, %c0_11] : memref<8x128xf32, #tpu.memory_space<vmem>>, vector<8x128xf32>
      tpu.vector_store %arg5[%c0_10, %c0_11], %12 {strides = array<i32>} : memref<8x128xf32, #tpu.memory_space<vmem>>, vector<8x128xf32>,
    } else {
    }
    %c0 = arith.constant 0 : index
    %c0_1 = arith.constant 0 : index
    %3 = vector.load %arg5[%c0, %c0_1] : memref<8x128xf32, #tpu.memory_space<vmem>>, vector<8x128xf32>
    %c0_2 = arith.constant 0 : index
    %c0_3 = arith.constant 0 : index
    %c0_4 = arith.constant 0 : index
    %4 = vector.load %arg1[%c0_2, %c0_3, %c0_4] : memref<8x16x128xbf16, #tpu.memory_space<vmem>>, vector<8x16x128xbf16>
    %5 = arith.extf %4 : vector<8x16x128xbf16> to vector<8x16x128xf32>
    %cst = arith.constant dense<0.000000e+00> : vector<8x128xf32>
    %6 = vector.multi_reduction <add>, %5, %cst [1] : vector<8x16x128xf32> to vector<8x128xf32>
    %7 = arith.addf %3, %6 : vector<8x128xf32>
    %c0_5 = arith.constant 0 : index
    %c0_6 = arith.constant 0 : index
    %8 = vector.load %arg5[%c0_5, %c0_6] : memref<8x128xf32, #tpu.memory_space<vmem>>, vector<8x128xf32>
    tpu.vector_store %arg5[%c0_5, %c0_6], %7 {strides = array<i32>} : memref<8x128xf32, #tpu.memory_space<vmem>>, vector<8x128xf32>,
    %c0_i32_7 = arith.constant 0 : i32
    %9 = arith.cmpi eq, %arg0, %c0_i32_7 : i32
    %10 = arith.extui %9 : i1 to i32
    %c0_i32_8 = arith.constant 0 : i32
    %11 = arith.cmpi ne, %10, %c0_i32_8 : i32
    scf.if %11 {
      %c0_9 = arith.constant 0 : index
      %c0_10 = arith.constant 0 : index
      %12 = vector.load %arg5[%c0_9, %c0_10] : memref<8x128xf32, #tpu.memory_space<vmem>>, vector<8x128xf32>
      %cst_11 = arith.constant 6.250000e-02 : f32
      %13 = vector.broadcast %cst_11 : f32 to vector<8x128xf32>
      %14 = arith.mulf %12, %13 : vector<8x128xf32>
      %c0_12 = arith.constant 0 : index
      %c0_13 = arith.constant 0 : index
      %15 = vector.load %arg2[%c0_12, %c0_13] : memref<128x128xf32, #tpu.memory_space<vmem>>, vector<128x128xf32>
      %cst_14 = arith.constant dense<0.000000e+00> : vector<8x128xf32>
      %16 = tpu.matmul %14, %15, %cst_14 {dimension_numbers = #tpu.dot_dimension_numbers<[1], [0], [0], [1], [0, 0, 1, 1], [], []>} : vector<8x128xf32>, vector<128x128xf32>, vector<8x128xf32> -> vector<8x128xf32>
      %c0_15 = arith.constant 0 : index
      %c0_16 = arith.constant 0 : index
      %17 = vector.load %arg3[%c0_15, %c0_16] : memref<1x128xf32, #tpu.memory_space<vmem>>, vector<1x128xf32>
      %18 = vector.broadcast %17 : vector<1x128xf32> to vector<8x128xf32>
      %19 = arith.addf %16, %18 : vector<8x128xf32>
      %c0_17 = arith.constant 0 : index
      %c0_18 = arith.constant 0 : index
      %20 = vector.load %arg4[%c0_17, %c0_18] : memref<8x128xf32, #tpu.memory_space<vmem>>, vector<8x128xf32>
      tpu.vector_store %arg4[%c0_17, %c0_18], %19 {strides = array<i32>} : memref<8x128xf32, #tpu.memory_space<vmem>>, vector<8x128xf32>,
    } else {
    }
    return
  }
  func.func @transform_0(%arg0: i32) -> (i32, i32, i32) {
    %c0_i32 = arith.constant 0 : i32
    %c0_i32_0 = arith.constant 0 : i32
    %c0_i32_1 = arith.constant 0 : i32
    return %c0_i32, %arg0, %c0_i32_0 : i32, i32, i32
  }
  func.func @transform_1(%arg0: i32) -> (i32, i32) {
    %c0_i32 = arith.constant 0 : i32
    %c0_i32_0 = arith.constant 0 : i32
    %c0_i32_1 = arith.constant 0 : i32
    return %c0_i32, %c0_i32_0 : i32, i32
  }
  func.func @transform_2(%arg0: i32) -> (i32, i32) {
    %c0_i32 = arith.constant 0 : i32
    %c0_i32_0 = arith.constant 0 : i32
    %c0_i32_1 = arith.constant 0 : i32
    return %c0_i32, %c0_i32_0 : i32, i32
  }
  func.func @transform_3(%arg0: i32) -> (i32, i32) {
    %c0_i32 = arith.constant 0 : i32
    %c0_i32_0 = arith.constant 0 : i32
    %c0_i32_1 = arith.constant 0 : i32
    return %c0_i32, %c0_i32_0 : i32, i32
  }
}

</mosaic_0001>

<bundles_post_ra>
// kernel: style_encoder_forward.4
= control target key start
LH: loop header
LB: loop body
LE: loop exit
PB: predicated region body
PF: predicated region fallthrough
CT: control target
= control target key end

     0   :  { %v2147_v0 = vmov 0   ;;  %s2605_s1 = inlined_call_operand.vmem [shape: bf16[256,128], index: 1, kind: input, shape index: {}]   ;;  %s2606_s0 = inlined_call_operand.vmem [shape: bf16[512,256], index: 0, kind: input, shape index: {}]   ;;  %s2607_s2 = inlined_call_operand.vmem [shape: f32[1,128], index: 2, kind: input, shape index: {}]   ;;  %s2608_s3 = inlined_call_operand.vmem [shape: bf16[512,128], index: 3, kind: output, shape index: {}]  }
   0x1   :  { %659 = vmatprep.subr.bf16.mxu0 %v2147_v0  ;;  %2002 = vmatprep.subr.bf16.mxu1 %v2147_v0  ;;  %v2035_v1 = vld [vmem:[%s2605_s1 + $0x38] sm:$0xff]   ;;  %v2036_v2 = vld [vmem:[%s2605_s1 + $0x30] sm:$0xff]   ;;  %v2037_v3 = vld [vmem:[%s2605_s1 + $0x28] sm:$0xff]  }
   0x2   :  { %660 = vmatpush1.bf16.msra.mxu0 %v2035_v1  ;;  %2018 = vmatpush1.bf16.msra.mxu1 %v2035_v1  ;;  %v2038_v4 = vld [vmem:[%s2605_s1 + $0x20] sm:$0xff]   ;;  %v2039_v5 = vld [vmem:[%s2605_s1 + $0x18] sm:$0xff]   ;;  %v2040_v7 = vld [vmem:[%s2605_s1 + $0x10] sm:$0xff]  }
   0x3   :  { %661 = vmatprep.subr.bf16.mxu0 %v2147_v0  ;;  %2003 = vmatprep.subr.bf16.mxu1 %v2147_v0  ;;  %v2053_v6 = vld [vmem:[%s2606_s0 + $0x4] ss:$8 sps:$4 sm:$0xff]   ;;  %v2043_v11 = vld [vmem:[%s2605_s1 + $0x78] sm:$0xff]   ;;  %v2044_v12 = vld [vmem:[%s2605_s1 + $0x70] sm:$0xff]  }
   0x4   :  { %v2056_v8 = vld [vmem:[%s2606_s0 + $0x104] ss:$8 sps:$4 sm:$0xff]   ;;  %691 = vmatprep.mubr.bf16.mxu0 %v2053_v6  ;;  %v2047_v15 = vld [vmem:[%s2605_s1 + $0x58] sm:$0xff]   ;;  %v2048_v16 = vld [vmem:[%s2605_s1 + $0x50] sm:$0xff]  }
   0x5   :  { %819 = vmatprep.mubr.bf16.mxu1 %v2056_v8  ;;  %v2041_v9 = vld [vmem:[%s2605_s1 + $0x8] sm:$0xff]   ;;  %v2042_v10 = vld [vmem:[%s2605_s1] sm:$0xff]   ;;  %v2057_v21 = vld [vmem:[%s2606_s0 + $0x14] ss:$8 sps:$4 sm:$0xff]  }
   0x6   :  { %662 = vmatpush1.bf16.msra.mxu0 %v2036_v2  ;;  %2019 = vmatpush1.bf16.msra.mxu1 %v2036_v2  ;;  %v2045_v13 = vld [vmem:[%s2605_s1 + $0x68] sm:$0xff]   ;;  %v2046_v14 = vld [vmem:[%s2605_s1 + $0x60] sm:$0xff]   ;;  %v2059_v22 = vld [vmem:[%s2606_s0 + $0x114] ss:$8 sps:$4 sm:$0xff]  }
   0x7   :  { %663 = vmatprep.subr.bf16.mxu0 %v2147_v0  ;;  %2004 = vmatprep.subr.bf16.mxu1 %v2147_v0  ;;  %v2049_v17 = vld [vmem:[%s2605_s1 + $0x48] sm:$0xff]   ;;  %v2050_v18 = vld [vmem:[%s2605_s1 + $0x40] sm:$0xff]   ;;  %v2061_v23 = vld [vmem:[%s2606_s0 + $0x10] ss:$8 sps:$4 sm:$0xff]  }
   0x8   :  { %v2051_v19 = vld [vmem:[%s2606_s0] ss:$8 sps:$4 sm:$0xff]   ;;  %v2062_v24 = vld [vmem:[%s2606_s0 + $0x110] ss:$8 sps:$4 sm:$0xff]   ;;  %v2063_v25 = vld [vmem:[%s2606_s0 + $0x24] ss:$8 sps:$4 sm:$0xff]  }
   0x9   :  { %v2054_v20 = vld [vmem:[%s2606_s0 + $0x100] ss:$8 sps:$4 sm:$0xff]   ;;  %v2065_v26 = vld [vmem:[%s2606_s0 + $0x124] ss:$8 sps:$4 sm:$0xff]   ;;  %v2069_v29 = vld [vmem:[%s2606_s0 + $0x34] ss:$8 sps:$4 sm:$0xff]  }
   0xa   :  { %664 = vmatpush1.bf16.msra.mxu0 %v2037_v3  ;;  %2020 = vmatpush1.bf16.msra.mxu1 %v2037_v3  ;;  %v2067_v27 = vld [vmem:[%s2606_s0 + $0x20] ss:$8 sps:$4 sm:$0xff]   ;;  %v2071_v30 = vld [vmem:[%s2606_s0 + $0x134] ss:$8 sps:$4 sm:$0xff]   ;;  %v2073_v31 = vld [vmem:[%s2606_s0 + $0x30] ss:$8 sps:$4 sm:$0xff]  }
   0xb   :  { %665 = vmatprep.subr.bf16.mxu0 %v2147_v0  ;;  %2005 = vmatprep.subr.bf16.mxu1 %v2147_v0  ;;  %v2068_v28 = vld [vmem:[%s2606_s0 + $0x120] ss:$8 sps:$4 sm:$0xff]   ;;  %v2074_v32 = vld [vmem:[%s2606_s0 + $0x130] ss:$8 sps:$4 sm:$0xff]   ;;  %v2075_v33 = vld [vmem:[%s2606_s0 + $0x44] ss:$8 sps:$4 sm:$0xff]  }
   0xc   :  { %v2077_v34 = vld [vmem:[%s2606_s0 + $0x144] ss:$8 sps:$4 sm:$0xff]   ;;  %v2079_v35 = vld [vmem:[%s2606_s0 + $0x40] ss:$8 sps:$4 sm:$0xff]   ;;  %v2081_v37 = vld [vmem:[%s2606_s0 + $0x54] ss:$8 sps:$4 sm:$0xff]  }
   0xd   :  { %v2080_v36 = vld [vmem:[%s2606_s0 + $0x140] ss:$8 sps:$4 sm:$0xff]   ;;  %v2083_v38 = vld [vmem:[%s2606_s0 + $0x154] ss:$8 sps:$4 sm:$0xff]   ;;  %v2085_v39 = vld [vmem:[%s2606_s0 + $0x50] ss:$8 sps:$4 sm:$0xff]  }
   0xe   :  { %666 = vmatpush1.bf16.msra.mxu0 %v2038_v4  ;;  %2021 = vmatpush1.bf16.msra.mxu1 %v2038_v4  ;;  %v2086_v40 = vld [vmem:[%s2606_s0 + $0x150] ss:$8 sps:$4 sm:$0xff]   ;;  %v2087_v41 = vld [vmem:[%s2606_s0 + $0x64] ss:$8 sps:$4 sm:$0xff]   ;;  %v2091_v43 = vld [vmem:[%s2606_s0 + $0x60] ss:$8 sps:$4 sm:$0xff]  }
   0xf   :  { %667 = vmatprep.subr.bf16.mxu0 %v2147_v0  ;;  %2006 = vmatprep.subr.bf16.mxu1 %v2147_v0  ;;  %v2089_v42 = vld [vmem:[%s2606_s0 + $0x164] ss:$8 sps:$4 sm:$0xff]   ;;  %v2092_v44 = vld [vmem:[%s2606_s0 + $0x160] ss:$8 sps:$4 sm:$0xff]   ;;  %v2093_v45 = vld [vmem:[%s2606_s0 + $0x74] ss:$8 sps:$4 sm:$0xff]  }
  0x10   :  { %v2095_v46 = vld [vmem:[%s2606_s0 + $0x174] ss:$8 sps:$4 sm:$0xff]   ;;  %v2097_v47 = vld [vmem:[%s2606_s0 + $0x70] ss:$8 sps:$4 sm:$0xff]   ;;  %v2099_v49 = vld [vmem:[%s2606_s0 + $0x84] ss:$8 sps:$4 sm:$0xff]  }
  0x11   :  { %v2098_v48 = vld [vmem:[%s2606_s0 + $0x170] ss:$8 sps:$4 sm:$0xff]   ;;  %v2101_v50 = vld [vmem:[%s2606_s0 + $0x184] ss:$8 sps:$4 sm:$0xff]   ;;  %v2103_v51 = vld [vmem:[%s2606_s0 + $0x80] ss:$8 sps:$4 sm:$0xff]  }
  0x12   :  { %668 = vmatpush1.bf16.msra.mxu0 %v2039_v5  ;;  %2022 = vmatpush1.bf16.msra.mxu1 %v2039_v5  ;;  %v2104_v52 = vld [vmem:[%s2606_s0 + $0x180] ss:$8 sps:$4 sm:$0xff]   ;;  %v2105_v53 = vld [vmem:[%s2606_s0 + $0x94] ss:$8 sps:$4 sm:$0xff]   ;;  %v2109_v55 = vld [vmem:[%s2606_s0 + $0x90] ss:$8 sps:$4 sm:$0xff]  }
  0x13   :  { %669 = vmatprep.subr.bf16.mxu0 %v2147_v0  ;;  %2007 = vmatprep.subr.bf16.mxu1 %v2147_v0  ;;  %v2107_v54 = vld [vmem:[%s2606_s0 + $0x194] ss:$8 sps:$4 sm:$0xff]   ;;  %v2110_v56 = vld [vmem:[%s2606_s0 + $0x190] ss:$8 sps:$4 sm:$0xff]   ;;  %v2111_v57 = vld [vmem:[%s2606_s0 + $0xa4] ss:$8 sps:$4 sm:$0xff]  }
  0x14   :  { %v2113_v58 = vld [vmem:[%s2606_s0 + $0x1a4] ss:$8 sps:$4 sm:$0xff]   ;;  %v2115_v59 = vld [vmem:[%s2606_s0 + $0xa0] ss:$8 sps:$4 sm:$0xff]   ;;  %v2117_v61 = vld [vmem:[%s2606_s0 + $0xb4] ss:$8 sps:$4 sm:$0xff]  }
  0x15   :  { %v2116_v60 = vld [vmem:[%s2606_s0 + $0x1a0] ss:$8 sps:$4 sm:$0xff]   ;;  %v2119_v62 = vld [vmem:[%s2606_s0 + $0x1b4] ss:$8 sps:$4 sm:$0xff]   ;;  %v2121_v63 = vld [vmem:[%s2606_s0 + $0xb0] ss:$8 sps:$4 sm:$0xff]  }
  0x16   :  { %670 = vmatpush1.bf16.msra.mxu0 %v2040_v7  ;;  %2023 = vmatpush1.bf16.msra.mxu1 %v2040_v7  ;;  %v2123_v1 = vld [vmem:[%s2606_s0 + $0xc4] ss:$8 sps:$4 sm:$0xff]   ;;  %v2127_v3 = vld [vmem:[%s2606_s0 + $0xc0] ss:$8 sps:$4 sm:$0xff]   ;;  %v2129_v5 = vld [vmem:[%s2606_s0 + $0xd4] ss:$8 sps:$4 sm:$0xff]  }
  0x17   :  { %671 = vmatprep.subr.bf16.mxu0 %v2147_v0  ;;  %2008 = vmatprep.subr.bf16.mxu1 %v2147_v0  ;;  %v2125_v2 = vld [vmem:[%s2606_s0 + $0x1c4] ss:$8 sps:$4 sm:$0xff]   ;;  %v2128_v4 = vld [vmem:[%s2606_s0 + $0x1c0] ss:$8 sps:$4 sm:$0xff]   ;;  %v2131_v6 = vld [vmem:[%s2606_s0 + $0x1d4] ss:$8 sps:$4 sm:$0xff]  }
  0x18   :  { %v2133_v7 = vld [vmem:[%s2606_s0 + $0xd0] ss:$8 sps:$4 sm:$0xff]  }
  0x19   :  { %v2134_v8 = vld [vmem:[%s2606_s0 + $0x1d0] ss:$8 sps:$4 sm:$0xff]  }
  0x1a   :  { %672 = vmatpush1.bf16.msra.mxu0 %v2041_v9  ;;  %2024 = vmatpush1.bf16.msra.mxu1 %v2041_v9  ;;  %v2135_v9 = vld [vmem:[%s2606_s0 + $0xe4] ss:$8 sps:$4 sm:$0xff]  }
  0x1b   :  { %673 = vmatprep.subr.bf16.mxu0 %v2147_v0  ;;  %2009 = vmatprep.subr.bf16.mxu1 %v2147_v0 }
  0x1e   :  { %674 = vmatpush1.bf16.msra.mxu0 %v2042_v10  ;;  %2025 = vmatpush1.bf16.msra.mxu1 %v2042_v10  ;;  %v2137_v10 = vld [vmem:[%s2606_s0 + $0x1e4] ss:$8 sps:$4 sm:$0xff]  }
  0x1f   :  { %675 = vmatprep.subr.bf16.mxu0 %v2147_v0  ;;  %2010 = vmatprep.subr.bf16.mxu1 %v2147_v0 }
  0x22   :  { %676 = vmatpush2.bf16.msra.mxu0 %v2043_v11  ;;  %2026 = vmatpush2.bf16.msra.mxu1 %v2043_v11  ;;  %v2139_v11 = vld [vmem:[%s2606_s0 + $0xe0] ss:$8 sps:$4 sm:$0xff]  }
  0x23   :  { %677 = vmatprep.subr.bf16.mxu0 %v2147_v0  ;;  %2011 = vmatprep.subr.bf16.mxu1 %v2147_v0 }
  0x26   :  { %678 = vmatpush2.bf16.msra.mxu0 %v2044_v12  ;;  %2027 = vmatpush2.bf16.msra.mxu1 %v2044_v12  ;;  %v2140_v12 = vld [vmem:[%s2606_s0 + $0x1e0] ss:$8 sps:$4 sm:$0xff]  }
  0x27   :  { %679 = vmatprep.subr.bf16.mxu0 %v2147_v0  ;;  %2012 = vmatprep.subr.bf16.mxu1 %v2147_v0 }
  0x2a   :  { %680 = vmatpush2.bf16.msra.mxu0 %v2045_v13  ;;  %2028 = vmatpush2.bf16.msra.mxu1 %v2045_v13  ;;  %v2141_v13 = vld [vmem:[%s2606_s0 + $0xf4] ss:$8 sps:$4 sm:$0xff]  }
  0x2b   :  { %681 = vmatprep.subr.bf16.mxu0 %v2147_v0  ;;  %2013 = vmatprep.subr.bf16.mxu1 %v2147_v0 }
  0x2e   :  { %682 = vmatpush2.bf16.msra.mxu0 %v2046_v14  ;;  %2029 = vmatpush2.bf16.msra.mxu1 %v2046_v14  ;;  %v2143_v14 = vld [vmem:[%s2606_s0 + $0x1f4] ss:$8 sps:$4 sm:$0xff]  }
  0x2f   :  { %683 = vmatprep.subr.bf16.mxu0 %v2147_v0  ;;  %2014 = vmatprep.subr.bf16.mxu1 %v2147_v0 }
  0x32   :  { %684 = vmatpush2.bf16.msra.mxu0 %v2047_v15  ;;  %2030 = vmatpush2.bf16.msra.mxu1 %v2047_v15  ;;  %v2145_v15 = vld [vmem:[%s2606_s0 + $0xf0] ss:$8 sps:$4 sm:$0xff]  }
  0x33   :  { %685 = vmatprep.subr.bf16.mxu0 %v2147_v0  ;;  %2015 = vmatprep.subr.bf16.mxu1 %v2147_v0 }
  0x36   :  { %686 = vmatpush2.bf16.msra.mxu0 %v2048_v16  ;;  %2031 = vmatpush2.bf16.msra.mxu1 %v2048_v16  ;;  %v2146_v16 = vld [vmem:[%s2606_s0 + $0x1f0] ss:$8 sps:$4 sm:$0xff]  }
  0x37   :  { %687 = vmatprep.subr.bf16.mxu0 %v2147_v0  ;;  %2016 = vmatprep.subr.bf16.mxu1 %v2147_v0 }
  0x3a   :  { %688 = vmatpush2.bf16.msra.mxu0 %v2049_v17  ;;  %2032 = vmatpush2.bf16.msra.mxu1 %v2049_v17 }
  0x3b   :  { %689 = vmatprep.subr.bf16.mxu0 %v2147_v0  ;;  %2017 = vmatprep.subr.bf16.mxu1 %v2147_v0  ;;  %v2122_v0 = vld [vmem:[%s2606_s0 + $0x1b0] ss:$8 sps:$4 sm:$0xff]  }
  0x3e   :  { %690 = vmatpush2.bf16.msra.mxu0 %v2050_v18  ;;  %2033 = vmatpush2.bf16.msra.mxu1 %v2050_v18  ;;  %v2443_v18 = vld [vmem:[%s2607_s2] ss:$0 sm:$0xff] }
  0x41   :  { %692 = vmatmul.mubr.bf16.vlgmr.msra.gmra.mxu0 %v2051_v19  ;;  %820 = vmatmul.mubr.bf16.vlgmr.msra.gmra.mxu1 %v2054_v20 }
  0x42   :  { %699 = vmatprep.mubr.bf16.mxu0 %v2057_v21  ;;  %827 = vmatprep.mubr.bf16.mxu1 %v2059_v22 }
  0x49   :  { %700 = vmatmul.mubr.bf16.gmra.mxu0 %v2061_v23  ;;  %828 = vmatmul.mubr.bf16.gmra.mxu1 %v2062_v24 }
  0x4a   :  { %707 = vmatprep.mubr.bf16.mxu0 %v2063_v25  ;;  %835 = vmatprep.mubr.bf16.mxu1 %v2065_v26 }
  0x51   :  { %708 = vmatmul.mubr.bf16.gmra.mxu0 %v2067_v27  ;;  %836 = vmatmul.mubr.bf16.gmra.mxu1 %v2068_v28 }
  0x52   :  { %715 = vmatprep.mubr.bf16.mxu0 %v2069_v29  ;;  %843 = vmatprep.mubr.bf16.mxu1 %v2071_v30 }
  0x59   :  { %716 = vmatmul.mubr.bf16.gmra.mxu0 %v2073_v31  ;;  %844 = vmatmul.mubr.bf16.gmra.mxu1 %v2074_v32 }
  0x5a   :  { %723 = vmatprep.mubr.bf16.mxu0 %v2075_v33  ;;  %851 = vmatprep.mubr.bf16.mxu1 %v2077_v34 }
  0x61   :  { %724 = vmatmul.mubr.bf16.gmra.mxu0 %v2079_v35  ;;  %852 = vmatmul.mubr.bf16.gmra.mxu1 %v2080_v36 }
  0x62   :  { %731 = vmatprep.mubr.bf16.mxu0 %v2081_v37  ;;  %859 = vmatprep.mubr.bf16.mxu1 %v2083_v38 }
  0x69   :  { %732 = vmatmul.mubr.bf16.gmra.mxu0 %v2085_v39  ;;  %860 = vmatmul.mubr.bf16.gmra.mxu1 %v2086_v40 }
  0x6a   :  { %739 = vmatprep.mubr.bf16.mxu0 %v2087_v41  ;;  %867 = vmatprep.mubr.bf16.mxu1 %v2089_v42 }
  0x71   :  { %740 = vmatmul.mubr.bf16.gmra.mxu0 %v2091_v43  ;;  %868 = vmatmul.mubr.bf16.gmra.mxu1 %v2092_v44 }
  0x72   :  { %747 = vmatprep.mubr.bf16.mxu0 %v2093_v45  ;;  %875 = vmatprep.mubr.bf16.mxu1 %v2095_v46 }
  0x79   :  { %748 = vmatmul.mubr.bf16.gmra.mxu0 %v2097_v47  ;;  %876 = vmatmul.mubr.bf16.gmra.mxu1 %v2098_v48 }
  0x7a   :  { %755 = vmatprep.mubr.bf16.mxu0 %v2099_v49  ;;  %883 = vmatprep.mubr.bf16.mxu1 %v2101_v50 }
  0x81   :  { %756 = vmatmul.mubr.bf16.gmra.mxu0 %v2103_v51  ;;  %884 = vmatmul.mubr.bf16.gmra.mxu1 %v2104_v52 }
  0x82   :  { %763 = vmatprep.mubr.bf16.mxu0 %v2105_v53  ;;  %891 = vmatprep.mubr.bf16.mxu1 %v2107_v54 }
  0x89   :  { %764 = vmatmul.mubr.bf16.gmra.mxu0 %v2109_v55  ;;  %892 = vmatmul.mubr.bf16.gmra.mxu1 %v2110_v56 }
  0x8a   :  { %771 = vmatprep.mubr.bf16.mxu0 %v2111_v57  ;;  %899 = vmatprep.mubr.bf16.mxu1 %v2113_v58 }
  0x91   :  { %772 = vmatmul.mubr.bf16.gmra.mxu0 %v2115_v59  ;;  %900 = vmatmul.mubr.bf16.gmra.mxu1 %v2116_v60 }
  0x92   :  { %779 = vmatprep.mubr.bf16.mxu0 %v2117_v61  ;;  %907 = vmatprep.mubr.bf16.mxu1 %v2119_v62 }
  0x99   :  { %780 = vmatmul.mubr.bf16.gmra.mxu0 %v2121_v63  ;;  %908 = vmatmul.mubr.bf16.gmra.mxu1 %v2122_v0 }
  0x9a   :  { %787 = vmatprep.mubr.bf16.mxu0 %v2123_v1  ;;  %915 = vmatprep.mubr.bf16.mxu1 %v2125_v2 }
  0xa1   :  { %788 = vmatmul.mubr.bf16.gmra.mxu0 %v2127_v3  ;;  %916 = vmatmul.mubr.bf16.gmra.mxu1 %v2128_v4 }
  0xa2   :  { %795 = vmatprep.mubr.bf16.mxu0 %v2129_v5  ;;  %923 = vmatprep.mubr.bf16.mxu1 %v2131_v6 }
  0xa9   :  { %796 = vmatmul.mubr.bf16.gmra.mxu0 %v2133_v7  ;;  %924 = vmatmul.mubr.bf16.gmra.mxu1 %v2134_v8 }
  0xaa   :  { %803 = vmatprep.mubr.bf16.mxu0 %v2135_v9  ;;  %931 = vmatprep.mubr.bf16.mxu1 %v2137_v10 }
  0xb1   :  { %804 = vmatmul.mubr.bf16.gmra.mxu0 %v2139_v11  ;;  %932 = vmatmul.mubr.bf16.gmra.mxu1 %v2140_v12 }
  0xb2   :  { %811 = vmatprep.mubr.bf16.mxu0 %v2141_v13  ;;  %939 = vmatprep.mubr.bf16.mxu1 %v2143_v14 }
  0xb9   :  { %812 = vmatmul.mubr.bf16.gmra.mxu0 %v2145_v15  ;;  %940 = vmatmul.mubr.bf16.gmra.mxu1 %v2146_v16 }
 0x101   :  { %v693_v17 = vpop.f32.mrf.mxu0  ;;  %v821_v19 = vpop.f32.mrf.mxu1 }
 0x102   :  { %v1150_v22 = vadd.f32 %v2443_v18, %v693_v17  ;;  %v1182_v23 = vadd.f32 %v2443_v18, %v821_v19 }
 0x103   :  { %v695_v20 = vpop.f32.mrf.mxu0  ;;  %v823_v21 = vpop.f32.mrf.mxu1 }
 0x104   :  { %v1214_v30 = vmax.f32 %v1150_v22, 0.0  ;;  %v1246_v31 = vmax.f32 %v1182_v23, 0.0 }
 0x105   :  { %v696_v24 = vpop.f32.mrf.mxu0  ;;  %v824_v25 = vpop.f32.mrf.mxu1 }
 0x106   :  { %v1151_v26 = vadd.f32 %v2443_v18, %v696_v24  ;;  %v1183_v27 = vadd.f32 %v2443_v18, %v824_v25 }
 0x107   :  { %v698_v28 = vpop.f32.mrf.mxu0  ;;  %v826_v29 = vpop.f32.mrf.mxu1 }
 0x108   :  { %v1215_v32 = vmax.f32 %v1151_v26, 0.0  ;;  %v1247_v33 = vmax.f32 %v1183_v27, 0.0 }
 0x109   :  { %v701_v34 = vpop.f32.mrf.mxu0  ;;  %v829_v35 = vpop.f32.mrf.mxu1 }
 0x10a   :  { %v1814_v36 = vpack.c.bf16 %v1215_v32, %v1214_v30  ;;  %v1894_v37 = vpack.c.bf16 %v1247_v33, %v1246_v31  ;;  %v1152_v40 = vadd.f32 %v2443_v18, %v701_v34  ;;  %v1184_v41 = vadd.f32 %v2443_v18, %v829_v35 }
 0x10b   :  { %v703_v38 = vpop.f32.mrf.mxu0  ;;  %v831_v39 = vpop.f32.mrf.mxu1 }
 0x10c   :  { %1815 = vst [vmem:[%s2608_s3] sm:$0xff] %v1814_v36   ;;  %1986 = vst [vmem:[%s2608_s3 + $0x80] sm:$0xff] %v1894_v37   ;;  %v1216_v48 = vmax.f32 %v1152_v40, 0.0  ;;  %v1248_v49 = vmax.f32 %v1184_v41, 0.0 }
 0x10d   :  { %v704_v42 = vpop.f32.mrf.mxu0  ;;  %v832_v43 = vpop.f32.mrf.mxu1 }
 0x10e   :  { %v1153_v44 = vadd.f32 %v2443_v18, %v704_v42  ;;  %v1185_v45 = vadd.f32 %v2443_v18, %v832_v43 }
 0x10f   :  { %v706_v46 = vpop.f32.mrf.mxu0  ;;  %v834_v47 = vpop.f32.mrf.mxu1 }
 0x110   :  { %v1217_v50 = vmax.f32 %v1153_v44, 0.0  ;;  %v1249_v51 = vmax.f32 %v1185_v45, 0.0 }
 0x111   :  { %v709_v52 = vpop.f32.mrf.mxu0  ;;  %v837_v53 = vpop.f32.mrf.mxu1 }
 0x112   :  { %v1819_v54 = vpack.c.bf16 %v1217_v50, %v1216_v48  ;;  %v1899_v55 = vpack.c.bf16 %v1249_v51, %v1248_v49  ;;  %v1154_v58 = vadd.f32 %v2443_v18, %v709_v52  ;;  %v1186_v59 = vadd.f32 %v2443_v18, %v837_v53 }
 0x113   :  { %v711_v56 = vpop.f32.mrf.mxu0  ;;  %v839_v57 = vpop.f32.mrf.mxu1 }
 0x114   :  { %1971 = vst [vmem:[%s2608_s3 + $0x8] sm:$0xff] %v1819_v54   ;;  %1987 = vst [vmem:[%s2608_s3 + $0x88] sm:$0xff] %v1899_v55   ;;  %v1218_v2 = vmax.f32 %v1154_v58, 0.0  ;;  %v1250_v3 = vmax.f32 %v1186_v59, 0.0 }
 0x115   :  { %v712_v60 = vpop.f32.mrf.mxu0  ;;  %v840_v61 = vpop.f32.mrf.mxu1 }
 0x116   :  { %v1155_v62 = vadd.f32 %v2443_v18, %v712_v60  ;;  %v1187_v63 = vadd.f32 %v2443_v18, %v840_v61 }
 0x117   :  { %v714_v0 = vpop.f32.mrf.mxu0  ;;  %v842_v1 = vpop.f32.mrf.mxu1 }
 0x118   :  { %v1219_v4 = vmax.f32 %v1155_v62, 0.0  ;;  %v1251_v5 = vmax.f32 %v1187_v63, 0.0 }
 0x119   :  { %v717_v6 = vpop.f32.mrf.mxu0  ;;  %v845_v7 = vpop.f32.mrf.mxu1 }
 0x11a   :  { %v1824_v8 = vpack.c.bf16 %v1219_v4, %v1218_v2  ;;  %v1904_v9 = vpack.c.bf16 %v1251_v5, %v1250_v3  ;;  %v1156_v12 = vadd.f32 %v2443_v18, %v717_v6  ;;  %v1188_v13 = vadd.f32 %v2443_v18, %v845_v7 }
 0x11b   :  { %v719_v10 = vpop.f32.mrf.mxu0  ;;  %v847_v11 = vpop.f32.mrf.mxu1 }
 0x11c   :  { %1972 = vst [vmem:[%s2608_s3 + $0x10] sm:$0xff] %v1824_v8   ;;  %1988 = vst [vmem:[%s2608_s3 + $0x90] sm:$0xff] %v1904_v9   ;;  %v1220_v21 = vmax.f32 %v1156_v12, 0.0  ;;  %v1252_v22 = vmax.f32 %v1188_v13, 0.0 }
 0x11d   :  { %v720_v14 = vpop.f32.mrf.mxu0  ;;  %v848_v15 = vpop.f32.mrf.mxu1 }
 0x11e   :  { %v1157_v16 = vadd.f32 %v2443_v18, %v720_v14  ;;  %v1189_v17 = vadd.f32 %v2443_v18, %v848_v15 }
 0x11f   :  { %v722_v19 = vpop.f32.mrf.mxu0  ;;  %v850_v20 = vpop.f32.mrf.mxu1 }
 0x120   :  { %v1221_v23 = vmax.f32 %v1157_v16, 0.0  ;;  %v1253_v24 = vmax.f32 %v1189_v17, 0.0 }
 0x121   :  { %v725_v25 = vpop.f32.mrf.mxu0  ;;  %v853_v26 = vpop.f32.mrf.mxu1 }
 0x122   :  { %v1829_v27 = vpack.c.bf16 %v1221_v23, %v1220_v21  ;;  %v1909_v28 = vpack.c.bf16 %v1253_v24, %v1252_v22  ;;  %v1158_v31 = vadd.f32 %v2443_v18, %v725_v25  ;;  %v1190_v32 = vadd.f32 %v2443_v18, %v853_v26 }
 0x123   :  { %v727_v29 = vpop.f32.mrf.mxu0  ;;  %v855_v30 = vpop.f32.mrf.mxu1 }
 0x124   :  { %1973 = vst [vmem:[%s2608_s3 + $0x18] sm:$0xff] %v1829_v27   ;;  %1989 = vst [vmem:[%s2608_s3 + $0x98] sm:$0xff] %v1909_v28   ;;  %v1222_v39 = vmax.f32 %v1158_v31, 0.0  ;;  %v1254_v40 = vmax.f32 %v1190_v32, 0.0 }
 0x125   :  { %v728_v33 = vpop.f32.mrf.mxu0  ;;  %v856_v34 = vpop.f32.mrf.mxu1 }
 0x126   :  { %v1159_v35 = vadd.f32 %v2443_v18, %v728_v33  ;;  %v1191_v36 = vadd.f32 %v2443_v18, %v856_v34 }
 0x127   :  { %v730_v37 = vpop.f32.mrf.mxu0  ;;  %v858_v38 = vpop.f32.mrf.mxu1 }
 0x128   :  { %v1223_v41 = vmax.f32 %v1159_v35, 0.0  ;;  %v1255_v42 = vmax.f32 %v1191_v36, 0.0 }
 0x129   :  { %v733_v43 = vpop.f32.mrf.mxu0  ;;  %v861_v44 = vpop.f32.mrf.mxu1 }
 0x12a   :  { %v1834_v45 = vpack.c.bf16 %v1223_v41, %v1222_v39  ;;  %v1914_v46 = vpack.c.bf16 %v1255_v42, %v1254_v40  ;;  %v1160_v49 = vadd.f32 %v2443_v18, %v733_v43  ;;  %v1192_v50 = vadd.f32 %v2443_v18, %v861_v44 }
 0x12b   :  { %v735_v47 = vpop.f32.mrf.mxu0  ;;  %v863_v48 = vpop.f32.mrf.mxu1 }
 0x12c   :  { %1974 = vst [vmem:[%s2608_s3 + $0x20] sm:$0xff] %v1834_v45   ;;  %1990 = vst [vmem:[%s2608_s3 + $0xa0] sm:$0xff] %v1914_v46   ;;  %v1224_v57 = vmax.f32 %v1160_v49, 0.0  ;;  %v1256_v58 = vmax.f32 %v1192_v50, 0.0 }
 0x12d   :  { %v736_v51 = vpop.f32.mrf.mxu0  ;;  %v864_v52 = vpop.f32.mrf.mxu1 }
 0x12e   :  { %v1161_v53 = vadd.f32 %v2443_v18, %v736_v51  ;;  %v1193_v54 = vadd.f32 %v2443_v18, %v864_v52 }
 0x12f   :  { %v738_v55 = vpop.f32.mrf.mxu0  ;;  %v866_v56 = vpop.f32.mrf.mxu1 }
 0x130   :  { %v1225_v59 = vmax.f32 %v1161_v53, 0.0  ;;  %v1257_v60 = vmax.f32 %v1193_v54, 0.0 }
 0x131   :  { %v741_v61 = vpop.f32.mrf.mxu0  ;;  %v869_v62 = vpop.f32.mrf.mxu1 }
 0x132   :  { %v1839_v63 = vpack.c.bf16 %v1225_v59, %v1224_v57  ;;  %v1919_v0 = vpack.c.bf16 %v1257_v60, %v1256_v58  ;;  %v1162_v3 = vadd.f32 %v2443_v18, %v741_v61  ;;  %v1194_v4 = vadd.f32 %v2443_v18, %v869_v62 }
 0x133   :  { %v743_v1 = vpop.f32.mrf.mxu0  ;;  %v871_v2 = vpop.f32.mrf.mxu1 }
 0x134   :  { %1975 = vst [vmem:[%s2608_s3 + $0x28] sm:$0xff] %v1839_v63   ;;  %1991 = vst [vmem:[%s2608_s3 + $0xa8] sm:$0xff] %v1919_v0   ;;  %v1226_v11 = vmax.f32 %v1162_v3, 0.0  ;;  %v1258_v12 = vmax.f32 %v1194_v4, 0.0 }
 0x135   :  { %v744_v5 = vpop.f32.mrf.mxu0  ;;  %v872_v6 = vpop.f32.mrf.mxu1 }
 0x136   :  { %v1163_v7 = vadd.f32 %v2443_v18, %v744_v5  ;;  %v1195_v8 = vadd.f32 %v2443_v18, %v872_v6 }
 0x137   :  { %v746_v9 = vpop.f32.mrf.mxu0  ;;  %v874_v10 = vpop.f32.mrf.mxu1 }
 0x138   :  { %v1227_v13 = vmax.f32 %v1163_v7, 0.0  ;;  %v1259_v14 = vmax.f32 %v1195_v8, 0.0 }
 0x139   :  { %v749_v15 = vpop.f32.mrf.mxu0  ;;  %v877_v16 = vpop.f32.mrf.mxu1 }
 0x13a   :  { %v1844_v17 = vpack.c.bf16 %v1227_v13, %v1226_v11  ;;  %v1924_v19 = vpack.c.bf16 %v1259_v14, %v1258_v12  ;;  %v1164_v22 = vadd.f32 %v2443_v18, %v749_v15  ;;  %v1196_v23 = vadd.f32 %v2443_v18, %v877_v16 }
 0x13b   :  { %v751_v20 = vpop.f32.mrf.mxu0  ;;  %v879_v21 = vpop.f32.mrf.mxu1 }
 0x13c   :  { %1976 = vst [vmem:[%s2608_s3 + $0x30] sm:$0xff] %v1844_v17   ;;  %1992 = vst [vmem:[%s2608_s3 + $0xb0] sm:$0xff] %v1924_v19   ;;  %v1228_v30 = vmax.f32 %v1164_v22, 0.0  ;;  %v1260_v31 = vmax.f32 %v1196_v23, 0.0 }
 0x13d   :  { %v752_v24 = vpop.f32.mrf.mxu0  ;;  %v880_v25 = vpop.f32.mrf.mxu1 }
 0x13e   :  { %v1165_v26 = vadd.f32 %v2443_v18, %v752_v24  ;;  %v1197_v27 = vadd.f32 %v2443_v18, %v880_v25 }
 0x13f   :  { %v754_v28 = vpop.f32.mrf.mxu0  ;;  %v882_v29 = vpop.f32.mrf.mxu1 }
 0x140   :  { %v1229_v32 = vmax.f32 %v1165_v26, 0.0  ;;  %v1261_v33 = vmax.f32 %v1197_v27, 0.0 }
 0x141   :  { %v757_v34 = vpop.f32.mrf.mxu0  ;;  %v885_v35 = vpop.f32.mrf.mxu1 }
 0x142   :  { %v1849_v36 = vpack.c.bf16 %v1229_v32, %v1228_v30  ;;  %v1929_v37 = vpack.c.bf16 %v1261_v33, %v1260_v31  ;;  %v1166_v40 = vadd.f32 %v2443_v18, %v757_v34  ;;  %v1198_v41 = vadd.f32 %v2443_v18, %v885_v35 }
 0x143   :  { %v759_v38 = vpop.f32.mrf.mxu0  ;;  %v887_v39 = vpop.f32.mrf.mxu1 }
 0x144   :  { %1977 = vst [vmem:[%s2608_s3 + $0x38] sm:$0xff] %v1849_v36   ;;  %1993 = vst [vmem:[%s2608_s3 + $0xb8] sm:$0xff] %v1929_v37   ;;  %v1230_v48 = vmax.f32 %v1166_v40, 0.0  ;;  %v1262_v49 = vmax.f32 %v1198_v41, 0.0 }
 0x145   :  { %v760_v42 = vpop.f32.mrf.mxu0  ;;  %v888_v43 = vpop.f32.mrf.mxu1 }
 0x146   :  { %v1167_v44 = vadd.f32 %v2443_v18, %v760_v42  ;;  %v1199_v45 = vadd.f32 %v2443_v18, %v888_v43 }
 0x147   :  { %v762_v46 = vpop.f32.mrf.mxu0  ;;  %v890_v47 = vpop.f32.mrf.mxu1 }
 0x148   :  { %v1231_v50 = vmax.f32 %v1167_v44, 0.0  ;;  %v1263_v51 = vmax.f32 %v1199_v45, 0.0 }
 0x149   :  { %v765_v52 = vpop.f32.mrf.mxu0  ;;  %v893_v53 = vpop.f32.mrf.mxu1 }
 0x14a   :  { %v1854_v54 = vpack.c.bf16 %v1231_v50, %v1230_v48  ;;  %v1934_v55 = vpack.c.bf16 %v1263_v51, %v1262_v49  ;;  %v1168_v58 = vadd.f32 %v2443_v18, %v765_v52  ;;  %v1200_v59 = vadd.f32 %v2443_v18, %v893_v53 }
 0x14b   :  { %v767_v56 = vpop.f32.mrf.mxu0  ;;  %v895_v57 = vpop.f32.mrf.mxu1 }
 0x14c   :  { %1978 = vst [vmem:[%s2608_s3 + $0x40] sm:$0xff] %v1854_v54   ;;  %1994 = vst [vmem:[%s2608_s3 + $0xc0] sm:$0xff] %v1934_v55   ;;  %v1232_v2 = vmax.f32 %v1168_v58, 0.0  ;;  %v1264_v3 = vmax.f32 %v1200_v59, 0.0 }
 0x14d   :  { %v768_v60 = vpop.f32.mrf.mxu0  ;;  %v896_v61 = vpop.f32.mrf.mxu1 }
 0x14e   :  { %v1169_v62 = vadd.f32 %v2443_v18, %v768_v60  ;;  %v1201_v63 = vadd.f32 %v2443_v18, %v896_v61 }
 0x14f   :  { %v770_v0 = vpop.f32.mrf.mxu0  ;;  %v898_v1 = vpop.f32.mrf.mxu1 }
 0x150   :  { %v1233_v4 = vmax.f32 %v1169_v62, 0.0  ;;  %v1265_v5 = vmax.f32 %v1201_v63, 0.0 }
 0x151   :  { %v773_v6 = vpop.f32.mrf.mxu0  ;;  %v901_v7 = vpop.f32.mrf.mxu1 }
 0x152   :  { %v1859_v8 = vpack.c.bf16 %v1233_v4, %v1232_v2  ;;  %v1939_v9 = vpack.c.bf16 %v1265_v5, %v1264_v3  ;;  %v1170_v12 = vadd.f32 %v2443_v18, %v773_v6  ;;  %v1202_v13 = vadd.f32 %v2443_v18, %v901_v7 }
 0x153   :  { %v775_v10 = vpop.f32.mrf.mxu0  ;;  %v903_v11 = vpop.f32.mrf.mxu1 }
 0x154   :  { %1979 = vst [vmem:[%s2608_s3 + $0x48] sm:$0xff] %v1859_v8   ;;  %1995 = vst [vmem:[%s2608_s3 + $0xc8] sm:$0xff] %v1939_v9   ;;  %v1234_v21 = vmax.f32 %v1170_v12, 0.0  ;;  %v1266_v22 = vmax.f32 %v1202_v13, 0.0 }
 0x155   :  { %v776_v14 = vpop.f32.mrf.mxu0  ;;  %v904_v15 = vpop.f32.mrf.mxu1 }
 0x156   :  { %v1171_v16 = vadd.f32 %v2443_v18, %v776_v14  ;;  %v1203_v17 = vadd.f32 %v2443_v18, %v904_v15 }
 0x157   :  { %v778_v19 = vpop.f32.mrf.mxu0  ;;  %v906_v20 = vpop.f32.mrf.mxu1 }
 0x158   :  { %v1235_v23 = vmax.f32 %v1171_v16, 0.0  ;;  %v1267_v24 = vmax.f32 %v1203_v17, 0.0 }
 0x159   :  { %v781_v25 = vpop.f32.mrf.mxu0  ;;  %v909_v26 = vpop.f32.mrf.mxu1 }
 0x15a   :  { %v1864_v27 = vpack.c.bf16 %v1235_v23, %v1234_v21  ;;  %v1944_v28 = vpack.c.bf16 %v1267_v24, %v1266_v22  ;;  %v1172_v31 = vadd.f32 %v2443_v18, %v781_v25  ;;  %v1204_v32 = vadd.f32 %v2443_v18, %v909_v26 }
 0x15b   :  { %v783_v29 = vpop.f32.mrf.mxu0  ;;  %v911_v30 = vpop.f32.mrf.mxu1 }
 0x15c   :  { %1980 = vst [vmem:[%s2608_s3 + $0x50] sm:$0xff] %v1864_v27   ;;  %1996 = vst [vmem:[%s2608_s3 + $0xd0] sm:$0xff] %v1944_v28   ;;  %v1236_v39 = vmax.f32 %v1172_v31, 0.0  ;;  %v1268_v40 = vmax.f32 %v1204_v32, 0.0 }
 0x15d   :  { %v784_v33 = vpop.f32.mrf.mxu0  ;;  %v912_v34 = vpop.f32.mrf.mxu1 }
 0x15e   :  { %v1173_v35 = vadd.f32 %v2443_v18, %v784_v33  ;;  %v1205_v36 = vadd.f32 %v2443_v18, %v912_v34 }
 0x15f   :  { %v786_v37 = vpop.f32.mrf.mxu0  ;;  %v914_v38 = vpop.f32.mrf.mxu1 }
 0x160   :  { %v1237_v41 = vmax.f32 %v1173_v35, 0.0  ;;  %v1269_v42 = vmax.f32 %v1205_v36, 0.0 }
 0x161   :  { %v789_v43 = vpop.f32.mrf.mxu0  ;;  %v917_v44 = vpop.f32.mrf.mxu1 }
 0x162   :  { %v1869_v45 = vpack.c.bf16 %v1237_v41, %v1236_v39  ;;  %v1949_v46 = vpack.c.bf16 %v1269_v42, %v1268_v40  ;;  %v1174_v49 = vadd.f32 %v2443_v18, %v789_v43  ;;  %v1206_v50 = vadd.f32 %v2443_v18, %v917_v44 }
 0x163   :  { %v791_v47 = vpop.f32.mrf.mxu0  ;;  %v919_v48 = vpop.f32.mrf.mxu1 }
 0x164   :  { %1981 = vst [vmem:[%s2608_s3 + $0x58] sm:$0xff] %v1869_v45   ;;  %1997 = vst [vmem:[%s2608_s3 + $0xd8] sm:$0xff] %v1949_v46   ;;  %v1238_v57 = vmax.f32 %v1174_v49, 0.0  ;;  %v1270_v58 = vmax.f32 %v1206_v50, 0.0 }
 0x165   :  { %v792_v51 = vpop.f32.mrf.mxu0  ;;  %v920_v52 = vpop.f32.mrf.mxu1 }
 0x166   :  { %v1175_v53 = vadd.f32 %v2443_v18, %v792_v51  ;;  %v1207_v54 = vadd.f32 %v2443_v18, %v920_v52 }
 0x167   :  { %v794_v55 = vpop.f32.mrf.mxu0  ;;  %v922_v56 = vpop.f32.mrf.mxu1 }
 0x168   :  { %v1239_v59 = vmax.f32 %v1175_v53, 0.0  ;;  %v1271_v60 = vmax.f32 %v1207_v54, 0.0 }
 0x169   :  { %v797_v61 = vpop.f32.mrf.mxu0  ;;  %v925_v62 = vpop.f32.mrf.mxu1 }
 0x16a   :  { %v1874_v63 = vpack.c.bf16 %v1239_v59, %v1238_v57  ;;  %v1954_v0 = vpack.c.bf16 %v1271_v60, %v1270_v58  ;;  %v1176_v3 = vadd.f32 %v2443_v18, %v797_v61  ;;  %v1208_v4 = vadd.f32 %v2443_v18, %v925_v62 }
 0x16b   :  { %v799_v1 = vpop.f32.mrf.mxu0  ;;  %v927_v2 = vpop.f32.mrf.mxu1 }
 0x16c   :  { %1982 = vst [vmem:[%s2608_s3 + $0x60] sm:$0xff] %v1874_v63   ;;  %1998 = vst [vmem:[%s2608_s3 + $0xe0] sm:$0xff] %v1954_v0   ;;  %v1240_v11 = vmax.f32 %v1176_v3, 0.0  ;;  %v1272_v12 = vmax.f32 %v1208_v4, 0.0 }
 0x16d   :  { %v800_v5 = vpop.f32.mrf.mxu0  ;;  %v928_v6 = vpop.f32.mrf.mxu1 }
 0x16e   :  { %v1177_v7 = vadd.f32 %v2443_v18, %v800_v5  ;;  %v1209_v8 = vadd.f32 %v2443_v18, %v928_v6 }
 0x16f   :  { %v802_v9 = vpop.f32.mrf.mxu0  ;;  %v930_v10 = vpop.f32.mrf.mxu1 }
 0x170   :  { %v1241_v13 = vmax.f32 %v1177_v7, 0.0  ;;  %v1273_v14 = vmax.f32 %v1209_v8, 0.0 }
 0x171   :  { %v805_v15 = vpop.f32.mrf.mxu0  ;;  %v933_v16 = vpop.f32.mrf.mxu1 }
 0x172   :  { %v1879_v17 = vpack.c.bf16 %v1241_v13, %v1240_v11  ;;  %v1959_v19 = vpack.c.bf16 %v1273_v14, %v1272_v12  ;;  %v1178_v22 = vadd.f32 %v2443_v18, %v805_v15  ;;  %v1210_v23 = vadd.f32 %v2443_v18, %v933_v16 }
 0x173   :  { %v807_v20 = vpop.f32.mrf.mxu0  ;;  %v935_v21 = vpop.f32.mrf.mxu1 }
 0x174   :  { %1983 = vst [vmem:[%s2608_s3 + $0x68] sm:$0xff] %v1879_v17   ;;  %1999 = vst [vmem:[%s2608_s3 + $0xe8] sm:$0xff] %v1959_v19   ;;  %v1242_v30 = vmax.f32 %v1178_v22, 0.0  ;;  %v1274_v31 = vmax.f32 %v1210_v23, 0.0 }
 0x175   :  { %v808_v24 = vpop.f32.mrf.mxu0  ;;  %v936_v25 = vpop.f32.mrf.mxu1 }
 0x176   :  { %v1179_v26 = vadd.f32 %v2443_v18, %v808_v24  ;;  %v1211_v27 = vadd.f32 %v2443_v18, %v936_v25 }
 0x177   :  { %v810_v28 = vpop.f32.mrf.mxu0  ;;  %v938_v29 = vpop.f32.mrf.mxu1 }
 0x178   :  { %v1243_v32 = vmax.f32 %v1179_v26, 0.0  ;;  %v1275_v33 = vmax.f32 %v1211_v27, 0.0 }
 0x179   :  { %v813_v34 = vpop.f32.mrf.mxu0  ;;  %v941_v35 = vpop.f32.mrf.mxu1 }
 0x17a   :  { %v1884_v36 = vpack.c.bf16 %v1243_v32, %v1242_v30  ;;  %v1964_v37 = vpack.c.bf16 %v1275_v33, %v1274_v31  ;;  %v1180_v40 = vadd.f32 %v2443_v18, %v813_v34  ;;  %v1212_v41 = vadd.f32 %v2443_v18, %v941_v35 }
 0x17b   :  { %v815_v38 = vpop.f32.mrf.mxu0  ;;  %v943_v39 = vpop.f32.mrf.mxu1 }
 0x17c   :  { %1984 = vst [vmem:[%s2608_s3 + $0x70] sm:$0xff] %v1884_v36   ;;  %2000 = vst [vmem:[%s2608_s3 + $0xf0] sm:$0xff] %v1964_v37   ;;  %v1244_v48 = vmax.f32 %v1180_v40, 0.0  ;;  %v1276_v49 = vmax.f32 %v1212_v41, 0.0 }
 0x17d   :  { %v816_v42 = vpop.f32.mrf.mxu0  ;;  %v944_v43 = vpop.f32.mrf.mxu1 }
 0x17e   :  { %v1181_v44 = vadd.f32 %v2443_v18, %v816_v42  ;;  %v1213_v45 = vadd.f32 %v2443_v18, %v944_v43 }
 0x17f   :  { %v818_v46 = vpop.f32.mrf.mxu0  ;;  %v946_v47 = vpop.f32.mrf.mxu1 }
 0x180   :  { %v1245_v50 = vmax.f32 %v1181_v44, 0.0  ;;  %v1277_v51 = vmax.f32 %v1213_v45, 0.0 }
 0x182   :  { %v1889_v52 = vpack.c.bf16 %v1245_v50, %v1244_v48  ;;  %v1969_v53 = vpack.c.bf16 %v1277_v51, %v1276_v49 }
 0x184   :  { %1985 = vst [vmem:[%s2608_s3 + $0x78] sm:$0xff] %v1889_v52   ;;  %2001 = vst [vmem:[%s2608_s3 + $0xf8] sm:$0xff] %v1969_v53  }

// kernel: style_encoder_forward.5
= control target key start
LH: loop header
LB: loop body
LE: loop exit
PB: predicated region body
PF: predicated region fallthrough
CT: control target
= control target key end

     0   :  { %s721_s1 = inlined_call_operand.vmem [shape: bf16[128,128], index: 1, kind: input, shape index: {}]   ;;  %s722_s0 = inlined_call_operand.vmem [shape: bf16[128,128], index: 0, kind: input, shape index: {}]   ;;  %s723_s2 = inlined_call_operand.vmem [shape: f32[1,128], index: 2, kind: input, shape index: {}]   ;;  %s724_s3 = inlined_call_operand.vmem [shape: bf16[128,128], index: 3, kind: output, shape index: {}]  }
   0x1   :  { %v610_v0 = vld [vmem:[%s721_s1 + $0x38] sm:$0xff]   ;;  %v611_v1 = vld [vmem:[%s721_s1 + $0x30] sm:$0xff]   ;;  %v612_v2 = vld [vmem:[%s721_s1 + $0x28] sm:$0xff]  }
   0x2   :  { %562 = vmatprep.subr.bf16.mxu0 %v610_v0  ;;  %594 = vmatprep.subr.bf16.mxu1 %v610_v0  ;;  %v613_v3 = vld [vmem:[%s721_s1 + $0x20] sm:$0xff]   ;;  %v614_v6 = vld [vmem:[%s721_s1 + $0x18] sm:$0xff]   ;;  %v615_v7 = vld [vmem:[%s721_s1 + $0x10] sm:$0xff]  }
   0x3   :  { %563 = vmatpush3.bf16.msra.mxu0 %v610_v0  ;;  %602 = vmatpush3.bf16.msra.mxu1 %v610_v0  ;;  %v618_v4 = vld [vmem:[%s722_s0] sm:$0xff]   ;;  %v616_v8 = vld [vmem:[%s721_s1 + $0x8] sm:$0xff]   ;;  %v622_v12 = vld [vmem:[%s722_s0 + $0x10] sm:$0xff]  }
   0x4   :  { %564 = vmatprep.subr.bf16.mxu0 %v611_v1  ;;  %595 = vmatprep.subr.bf16.mxu1 %v611_v1  ;;  %v619_v5 = vld [vmem:[%s722_s0 + $0x20] sm:$0xff]   ;;  %v620_v10 = vld [vmem:[%s722_s0 + $0x8] sm:$0xff]   ;;  %v623_v13 = vld [vmem:[%s722_s0 + $0x30] sm:$0xff]  }
   0x5   :  { %578 = vmatprep.mubr.bf16.mxu0 %v618_v4  ;;  %586 = vmatprep.mubr.bf16.mxu1 %v619_v5  ;;  %v617_v9 = vld [vmem:[%s721_s1] sm:$0xff]   ;;  %v621_v11 = vld [vmem:[%s722_s0 + $0x28] sm:$0xff]   ;;  %v624_v14 = vld [vmem:[%s722_s0 + $0x18] sm:$0xff]  }
   0x6   :  { %v625_v15 = vld [vmem:[%s722_s0 + $0x38] sm:$0xff]   ;;  %v466_v16 = vld [vmem:[%s723_s2] ss:$0 sm:$0xff] }
   0x7   :  { %565 = vmatpush3.bf16.msra.mxu0 %v611_v1  ;;  %603 = vmatpush3.bf16.msra.mxu1 %v611_v1 }
   0x8   :  { %566 = vmatprep.subr.bf16.mxu0 %v612_v2  ;;  %596 = vmatprep.subr.bf16.mxu1 %v612_v2 }
   0xb   :  { %567 = vmatpush3.bf16.msra.mxu0 %v612_v2  ;;  %604 = vmatpush3.bf16.msra.mxu1 %v612_v2 }
   0xc   :  { %568 = vmatprep.subr.bf16.mxu0 %v613_v3  ;;  %597 = vmatprep.subr.bf16.mxu1 %v613_v3 }
   0xf   :  { %569 = vmatpush3.bf16.msra.mxu0 %v613_v3  ;;  %605 = vmatpush3.bf16.msra.mxu1 %v613_v3 }
  0x10   :  { %570 = vmatprep.subr.bf16.mxu0 %v614_v6  ;;  %598 = vmatprep.subr.bf16.mxu1 %v614_v6 }
  0x13   :  { %571 = vmatpush3.bf16.msra.mxu0 %v614_v6  ;;  %606 = vmatpush3.bf16.msra.mxu1 %v614_v6 }
  0x14   :  { %572 = vmatprep.subr.bf16.mxu0 %v615_v7  ;;  %599 = vmatprep.subr.bf16.mxu1 %v615_v7 }
  0x17   :  { %573 = vmatpush3.bf16.msra.mxu0 %v615_v7  ;;  %607 = vmatpush3.bf16.msra.mxu1 %v615_v7 }
  0x18   :  { %574 = vmatprep.subr.bf16.mxu0 %v616_v8  ;;  %600 = vmatprep.subr.bf16.mxu1 %v616_v8 }
  0x1b   :  { %575 = vmatpush3.bf16.msra.mxu0 %v616_v8  ;;  %608 = vmatpush3.bf16.msra.mxu1 %v616_v8 }
  0x1c   :  { %576 = vmatprep.subr.bf16.mxu0 %v617_v9  ;;  %601 = vmatprep.subr.bf16.mxu1 %v617_v9 }
  0x1f   :  { %577 = vmatpush3.bf16.msra.mxu0 %v617_v9  ;;  %609 = vmatpush3.bf16.msra.mxu1 %v617_v9 }
  0x22   :  { %579 = vmatmul.mubr.bf16.vlgmr.msra.gmra.mxu0 %v620_v10  ;;  %587 = vmatmul.mubr.bf16.vlgmr.msra.gmra.mxu1 %v621_v11 }
  0x23   :  { %582 = vmatprep.mubr.bf16.mxu0 %v622_v12  ;;  %590 = vmatprep.mubr.bf16.mxu1 %v623_v13 }
  0x2a   :  { %583 = vmatmul.mubr.bf16.gmra.mxu0 %v624_v14  ;;  %591 = vmatmul.mubr.bf16.gmra.mxu1 %v625_v15 }
  0xe2   :  { %v580_v17 = vpop.f32.mrf.mxu0  ;;  %v588_v18 = vpop.f32.mrf.mxu1 }
  0xe3   :  { %v336_v19 = vadd.f32 %v580_v17, %v466_v16  ;;  %v344_v20 = vadd.f32 %v588_v18, %v466_v16 }
  0xe4   :  { %v213_v21 = vpop.f32.mrf.mxu0  ;;  %v245_v22 = vpop.f32.mrf.mxu1 }
  0xe5   :  { %v334_v23 = vadd.f32 %v466_v16, %v213_v21  ;;  %v342_v24 = vadd.f32 %v466_v16, %v245_v22  ;;  %v352_v29 = vmax.f32 %v336_v19, 0.0  ;;  %v360_v30 = vmax.f32 %v344_v20, 0.0 }
  0xe6   :  { %v581_v25 = vpop.f32.mrf.mxu0  ;;  %v589_v26 = vpop.f32.mrf.mxu1 }
  0xe7   :  { %v337_v27 = vadd.f32 %v581_v25, %v466_v16  ;;  %v345_v28 = vadd.f32 %v589_v26, %v466_v16  ;;  %v350_v37 = vmax.f32 %v334_v23, 0.0  ;;  %v358_v38 = vmax.f32 %v342_v24, 0.0 }
  0xe8   :  { %v216_v31 = vpop.f32.mrf.mxu0  ;;  %v248_v32 = vpop.f32.mrf.mxu1 }
  0xe9   :  { %v353_v33 = vmax.f32 %v337_v27, 0.0  ;;  %v361_v34 = vmax.f32 %v345_v28, 0.0  ;;  %v335_v35 = vadd.f32 %v466_v16, %v216_v31  ;;  %v343_v36 = vadd.f32 %v466_v16, %v248_v32 }
  0xea   :  { %v584_v39 = vpop.f32.mrf.mxu0  ;;  %v592_v40 = vpop.f32.mrf.mxu1 }
  0xeb   :  { %v507_v41 = vpack.c.bf16 %v353_v33, %v352_v29  ;;  %v527_v42 = vpack.c.bf16 %v361_v34, %v360_v30  ;;  %v351_v43 = vmax.f32 %v335_v35, 0.0  ;;  %v359_v44 = vmax.f32 %v343_v36, 0.0 }
  0xec   :  { %v340_v45 = vadd.f32 %v584_v39, %v466_v16  ;;  %v348_v46 = vadd.f32 %v592_v40, %v466_v16  ;;  %v229_v47 = vpop.f32.mrf.mxu0  ;;  %v261_v48 = vpop.f32.mrf.mxu1 }
  0xed   :  { %539 = vst [vmem:[%s724_s3 + $0x8] sm:$0xff] %v507_v41   ;;  %543 = vst [vmem:[%s724_s3 + $0x28] sm:$0xff] %v527_v42   ;;  %v502_v49 = vpack.c.bf16 %v351_v43, %v350_v37  ;;  %v522_v50 = vpack.c.bf16 %v359_v44, %v358_v38  ;;  %v338_v51 = vadd.f32 %v466_v16, %v229_v47 }
  0xee   :  { %v346_v52 = vadd.f32 %v466_v16, %v261_v48  ;;  %v585_v53 = vpop.f32.mrf.mxu0  ;;  %v593_v54 = vpop.f32.mrf.mxu1  ;;  %v356_v57 = vmax.f32 %v340_v45, 0.0  ;;  %v364_v58 = vmax.f32 %v348_v46, 0.0 }
  0xef   :  { %503 = vst [vmem:[%s724_s3] sm:$0xff] %v502_v49   ;;  %542 = vst [vmem:[%s724_s3 + $0x20] sm:$0xff] %v522_v50   ;;  %v341_v55 = vadd.f32 %v585_v53, %v466_v16  ;;  %v349_v56 = vadd.f32 %v593_v54, %v466_v16  ;;  %v354_v1 = vmax.f32 %v338_v51, 0.0 }
  0xf0   :  { %v232_v59 = vpop.f32.mrf.mxu0  ;;  %v264_v60 = vpop.f32.mrf.mxu1  ;;  %v362_v2 = vmax.f32 %v346_v52, 0.0 }
  0xf1   :  { %v357_v61 = vmax.f32 %v341_v55, 0.0  ;;  %v365_v62 = vmax.f32 %v349_v56, 0.0  ;;  %v339_v63 = vadd.f32 %v466_v16, %v232_v59  ;;  %v347_v0 = vadd.f32 %v466_v16, %v264_v60 }
  0xf3   :  { %v517_v3 = vpack.c.bf16 %v357_v61, %v356_v57  ;;  %v537_v4 = vpack.c.bf16 %v365_v62, %v364_v58  ;;  %v355_v5 = vmax.f32 %v339_v63, 0.0  ;;  %v363_v6 = vmax.f32 %v347_v0, 0.0 }
  0xf5   :  { %541 = vst [vmem:[%s724_s3 + $0x18] sm:$0xff] %v517_v3   ;;  %545 = vst [vmem:[%s724_s3 + $0x38] sm:$0xff] %v537_v4   ;;  %v512_v7 = vpack.c.bf16 %v355_v5, %v354_v1  ;;  %v532_v8 = vpack.c.bf16 %v363_v6, %v362_v2 }
  0xf7   :  { %540 = vst [vmem:[%s724_s3 + $0x10] sm:$0xff] %v512_v7   ;;  %544 = vst [vmem:[%s724_s3 + $0x30] sm:$0xff] %v532_v8  }

// kernel: style_encoder_forward.6
= control target key start
LH: loop header
LB: loop body
LE: loop exit
PB: predicated region body
PF: predicated region fallthrough
CT: control target
= control target key end

     0   :  { %s477_s1 = inlined_call_operand.vmem [shape: bf16[256,128], index: 1, kind: input, shape index: {}]   ;;  %s478_s0 = inlined_call_operand.vmem [shape: bf16[32,256], index: 0, kind: input, shape index: {}]   ;;  %s479_s2 = inlined_call_operand.vmem [shape: f32[1,128], index: 2, kind: input, shape index: {}]   ;;  %s480_s3 = inlined_call_operand.vmem [shape: bf16[32,128], index: 3, kind: output, shape index: {}]  }
   0x1   :  { %v366_v0 = vld [vmem:[%s477_s1 + $0x78] sm:$0xff]   ;;  %v368_v2 = vld [vmem:[%s477_s1 + $0x70] sm:$0xff]   ;;  %v370_v4 = vld [vmem:[%s477_s1 + $0x68] sm:$0xff]  }
   0x2   :  { %v367_v1 = vld [vmem:[%s477_s1 + $0x38] sm:$0xff]   ;;  %322 = vmatprep.subr.bf16.mxu0 %v366_v0  ;;  %350 = vmatprep.subr.bf16.mxu1 %v366_v0  ;;  %v369_v3 = vld [vmem:[%s477_s1 + $0x30] sm:$0xff]   ;;  %v371_v5 = vld [vmem:[%s477_s1 + $0x28] sm:$0xff]  }
   0x3   :  { %323 = vmatpush3.bf16.msra.mxu0 %v367_v1  ;;  %358 = vmatpush3.bf16.msra.mxu1 %v367_v1  ;;  %v372_v6 = vld [vmem:[%s477_s1 + $0x60] sm:$0xff]   ;;  %v374_v8 = vld [vmem:[%s477_s1 + $0x58] sm:$0xff]   ;;  %v376_v10 = vld [vmem:[%s477_s1 + $0x50] sm:$0xff]  }
   0x4   :  { %324 = vmatprep.subr.bf16.mxu0 %v368_v2  ;;  %351 = vmatprep.subr.bf16.mxu1 %v368_v2  ;;  %v373_v7 = vld [vmem:[%s477_s1 + $0x20] sm:$0xff]   ;;  %v375_v9 = vld [vmem:[%s477_s1 + $0x18] sm:$0xff]   ;;  %v377_v13 = vld [vmem:[%s477_s1 + $0x10] sm:$0xff]  }
   0x5   :  { %v384_v11 = vld [vmem:[%s478_s0 + $0x4] ss:$8 sps:$4 sm:$0xff]   ;;  %v387_v12 = vld [vmem:[%s478_s0 + $0x14] ss:$8 sps:$4 sm:$0xff]   ;;  %v382_v18 = vld [vmem:[%s478_s0] ss:$8 sps:$4 sm:$0xff]  }
   0x6   :  { %v378_v14 = vld [vmem:[%s477_s1 + $0x48] sm:$0xff]   ;;  %211 = vmatprep.mubr.bf16.mxu0 %v384_v11  ;;  %219 = vmatprep.mubr.bf16.mxu1 %v387_v12  ;;  %v380_v16 = vld [vmem:[%s477_s1 + $0x40] sm:$0xff]   ;;  %v385_v19 = vld [vmem:[%s478_s0 + $0x10] ss:$8 sps:$4 sm:$0xff]  }
   0x7   :  { %325 = vmatpush3.bf16.msra.mxu0 %v369_v3  ;;  %359 = vmatpush3.bf16.msra.mxu1 %v369_v3  ;;  %v379_v15 = vld [vmem:[%s477_s1 + $0x8] sm:$0xff]   ;;  %v381_v17 = vld [vmem:[%s477_s1] sm:$0xff]  }
   0x8   :  { %326 = vmatprep.subr.bf16.mxu0 %v370_v4  ;;  %352 = vmatprep.subr.bf16.mxu1 %v370_v4  ;;  %v302_v26 = vld [vmem:[%s479_s2] ss:$0 sm:$0xff] }
   0xb   :  { %327 = vmatpush3.bf16.msra.mxu0 %v371_v5  ;;  %360 = vmatpush3.bf16.msra.mxu1 %v371_v5 }
   0xc   :  { %328 = vmatprep.subr.bf16.mxu0 %v372_v6  ;;  %353 = vmatprep.subr.bf16.mxu1 %v372_v6 }
   0xf   :  { %329 = vmatpush3.bf16.msra.mxu0 %v373_v7  ;;  %361 = vmatpush3.bf16.msra.mxu1 %v373_v7 }
  0x10   :  { %330 = vmatprep.subr.bf16.mxu0 %v374_v8  ;;  %354 = vmatprep.subr.bf16.mxu1 %v374_v8 }
  0x13   :  { %331 = vmatpush3.bf16.msra.mxu0 %v375_v9  ;;  %362 = vmatpush3.bf16.msra.mxu1 %v375_v9 }
  0x14   :  { %332 = vmatprep.subr.bf16.mxu0 %v376_v10  ;;  %355 = vmatprep.subr.bf16.mxu1 %v376_v10 }
  0x17   :  { %333 = vmatpush3.bf16.msra.mxu0 %v377_v13  ;;  %363 = vmatpush3.bf16.msra.mxu1 %v377_v13 }
  0x18   :  { %334 = vmatprep.subr.bf16.mxu0 %v378_v14  ;;  %356 = vmatprep.subr.bf16.mxu1 %v378_v14 }
  0x1b   :  { %335 = vmatpush3.bf16.msra.mxu0 %v379_v15  ;;  %364 = vmatpush3.bf16.msra.mxu1 %v379_v15 }
  0x1c   :  { %336 = vmatprep.subr.bf16.mxu0 %v380_v16  ;;  %357 = vmatprep.subr.bf16.mxu1 %v380_v16 }
  0x1f   :  { %337 = vmatpush3.bf16.msra.mxu0 %v381_v17  ;;  %365 = vmatpush3.bf16.msra.mxu1 %v381_v17 }
  0x22   :  { %212 = vmatmul.mubr.bf16.vlgmr.msra.gmra.mxu0 %v382_v18  ;;  %220 = vmatmul.mubr.bf16.vlgmr.msra.gmra.mxu1 %v385_v19 }
  0xe2   :  { %v338_v20 = vpop.f32.mrf.mxu0  ;;  %v344_v21 = vpop.f32.mrf.mxu1 }
  0xe4   :  { %v339_v22 = vpop.f32.mrf.mxu0  ;;  %v345_v23 = vpop.f32.mrf.mxu1 }
  0xe5   :  { %v340_v24 = vadd.f32 %v339_v22, %v338_v20  ;;  %v346_v25 = vadd.f32 %v345_v23, %v344_v21 }
  0xe6   :  { %v341_v27 = vpop.f32.mrf.mxu0  ;;  %v347_v28 = vpop.f32.mrf.mxu1 }
  0xe7   :  { %v250_v31 = vadd.f32 %v340_v24, %v302_v26  ;;  %v252_v32 = vadd.f32 %v346_v25, %v302_v26 }
  0xe8   :  { %v342_v29 = vpop.f32.mrf.mxu0  ;;  %v348_v30 = vpop.f32.mrf.mxu1 }
  0xe9   :  { %v343_v33 = vadd.f32 %v342_v29, %v341_v27  ;;  %v349_v34 = vadd.f32 %v348_v30, %v347_v28  ;;  %v254_v37 = vmax.f32 %v250_v31, 0.0  ;;  %v256_v38 = vmax.f32 %v252_v32, 0.0 }
  0xeb   :  { %v251_v35 = vadd.f32 %v343_v33, %v302_v26  ;;  %v253_v36 = vadd.f32 %v349_v34, %v302_v26 }
  0xed   :  { %v255_v39 = vmax.f32 %v251_v35, 0.0  ;;  %v257_v40 = vmax.f32 %v253_v36, 0.0 }
  0xef   :  { %v314_v41 = vpack.c.bf16 %v255_v39, %v254_v37  ;;  %v319_v42 = vpack.c.bf16 %v257_v40, %v256_v38 }
  0xf1   :  { %315 = vst [vmem:[%s480_s3] sm:$0xff] %v314_v41   ;;  %321 = vst [vmem:[%s480_s3 + $0x8] sm:$0xff] %v319_v42  }

// kernel: style_encoder_forward.7
= control target key start
LH: loop header
LB: loop body
LE: loop exit
PB: predicated region body
PF: predicated region fallthrough
CT: control target
= control target key end

     0   :  { %v330_v0 = vmov 0.0   ;;  %vm331_vm0 = vmmov 0   ;;  %vm116_vm1 = vcmask 1041409   ;;  %vm118_vm2 = vcmask 1042434   ;;  %s449_s1 = inlined_call_operand.vmem [shape: f32[128,128], index: 1, kind: input, shape index: {}]   ;;  %s450_s0 = inlined_call_operand.vmem [shape: bf16[8,16,128], index: 0, kind: input, shape index: {}]   ;;  %s451_s2 = inlined_call_operand.vmem [shape: f32[1,128], index: 2, kind: input, shape index: {}]   ;;  %s452_s3 = inlined_call_operand.vmem [shape: f32[8,128], index: 3, kind: output, shape index: {}]  }
   0x1   :  { %293 = vmatprep.subr.mxu0 %v330_v0  ;;  %v153_v1 = vld [vmem:[%s449_s1 + $0x78] sm:$0xff]  ;;  %v152_v2 = vld [vmem:[%s449_s1 + $0x70] sm:$0xff]  ;;  %325 = vmatprep.mubr.msk.f32.mxu0 %vm331_vm0, %v330_v0  ;;  %v151_v3 = vld [vmem:[%s449_s1 + $0x68] sm:$0xff]  ;;  %vm120_vm3 = vcmask 1043459   ;;  %vm122_vm4 = vcmask 1044484   ;;  %vm124_vm5 = vcmask 1045509  }
   0x2   :  { %294 = vmatpush3.msra.mxu0 %v153_v1  ;;  %v150_v4 = vld [vmem:[%s449_s1 + $0x60] sm:$0xff]  ;;  %v149_v5 = vld [vmem:[%s449_s1 + $0x58] sm:$0xff]  ;;  %v269_v7 = vld [vmem:[%s450_s0 + $0x8] sm:$0xff]   ;;  %vm126_vm6 = vcmask 1046534   ;;  %vm128_vm7 = vcmask 1047559  }
   0x3   :  { %295 = vmatprep.subr.mxu0 %v330_v0  ;;  %v238_v6 = vld [vmem:[%s450_s0] sm:$0xff]   ;;  %v243_v10 = vunpack.c.l.bf16 %v269_v7  ;;  %v244_v11 = vunpack.c.h.bf16 %v269_v7  ;;  %v270_v12 = vld [vmem:[%s450_s0 + $0x10] sm:$0xff]   ;;  %v271_v13 = vld [vmem:[%s450_s0 + $0x18] sm:$0xff]  }
   0x4   :  { %296 = vmatpush3.msra.mxu0 %v152_v2  ;;  %v239_v8 = vunpack.c.l.bf16 %v238_v6  ;;  %v240_v9 = vunpack.c.h.bf16 %v238_v6  ;;  %v272_v14 = vld [vmem:[%s450_s0 + $0x20] sm:$0xff]   ;;  %v247_v15 = vunpack.c.l.bf16 %v270_v12  ;;  %v248_v16 = vunpack.c.h.bf16 %v270_v12  ;;  %v273_v19 = vld [vmem:[%s450_s0 + $0x28] sm:$0xff]   ;;  %v274_v20 = vld [vmem:[%s450_s0 + $0x30] sm:$0xff]  }
   0x5   :  { %297 = vmatprep.subr.mxu0 %v330_v0  ;;  %v251_v17 = vunpack.c.l.bf16 %v271_v13  ;;  %v252_v18 = vunpack.c.h.bf16 %v271_v13  ;;  %v275_v21 = vld [vmem:[%s450_s0 + $0x38] sm:$0xff]   ;;  %v148_v22 = vld [vmem:[%s449_s1 + $0x50] sm:$0xff]  ;;  %v255_v23 = vunpack.c.l.bf16 %v272_v14  ;;  %v256_v24 = vunpack.c.h.bf16 %v272_v14  ;;  %v147_v31 = vld [vmem:[%s449_s1 + $0x48] sm:$0xff] }
   0x6   :  { %298 = vmatpush3.msra.mxu0 %v151_v3  ;;  %v259_v25 = vunpack.c.l.bf16 %v273_v19  ;;  %v260_v26 = vunpack.c.h.bf16 %v273_v19  ;;  %v263_v27 = vunpack.c.l.bf16 %v274_v20  ;;  %v264_v28 = vunpack.c.h.bf16 %v274_v20  ;;  %v146_v40 = vld [vmem:[%s449_s1 + $0x40] sm:$0xff]  ;;  %v145_v49 = vld [vmem:[%s449_s1 + $0x38] sm:$0xff]  ;;  %v144_v58 = vld [vmem:[%s449_s1 + $0x30] sm:$0xff] }
   0x7   :  { %299 = vmatprep.subr.mxu0 %v330_v0  ;;  %v267_v29 = vunpack.c.l.bf16 %v275_v21  ;;  %v268_v30 = vunpack.c.h.bf16 %v275_v21  ;;  %v52_v32 = vadd.f32 %v240_v9, %v239_v8  ;;  %v59_v33 = vadd.f32 %v244_v11, %v243_v10  ;;  %v142_v13 = vld [vmem:[%s449_s1 + $0x20] sm:$0xff] }
   0x8   :  { %300 = vmatpush3.msra.mxu0 %v150_v4  ;;  %v66_v34 = vadd.f32 %v248_v16, %v247_v15  ;;  %v73_v35 = vadd.f32 %v252_v18, %v251_v17  ;;  %v80_v36 = vadd.f32 %v256_v24, %v255_v23  ;;  %v87_v37 = vadd.f32 %v260_v26, %v259_v25  ;;  %v143_v4 = vld [vmem:[%s449_s1 + $0x28] sm:$0xff] }
   0x9   :  { %301 = vmatprep.subr.mxu0 %v330_v0  ;;  %v94_v38 = vadd.f32 %v264_v28, %v263_v27  ;;  %v101_v39 = vadd.f32 %v268_v30, %v267_v29  ;;  %v53_v41 = vrot.slane %v52_v32, 4  ;;  %v60_v42 = vrot.slane %v59_v33, 4  ;;  %v140_v28 = vld [vmem:[%s449_s1 + $0x10] sm:$0xff] }
   0xa   :  { %302 = vmatpush3.msra.mxu0 %v149_v5  ;;  %v67_v43 = vrot.slane %v66_v34, 4  ;;  %v74_v44 = vrot.slane %v73_v35, 4  ;;  %v81_v45 = vrot.slane %v80_v36, 4  ;;  %v88_v46 = vrot.slane %v87_v37, 4 }
   0xb   :  { %303 = vmatprep.subr.mxu0 %v330_v0  ;;  %v95_v47 = vrot.slane %v94_v38, 4  ;;  %v102_v48 = vrot.slane %v101_v39, 4  ;;  %v54_v50 = vadd.f32 %v53_v41, %v52_v32  ;;  %v61_v51 = vadd.f32 %v60_v42, %v59_v33  ;;  %v139_v33 = vld [vmem:[%s449_s1 + $0x8] sm:$0xff]  ;;  %v236_v42 = vld [vmem:[%s451_s2] ss:$0 sm:$0xff] }
   0xc   :  { %304 = vmatpush3.msra.mxu0 %v148_v22  ;;  %v68_v52 = vadd.f32 %v67_v43, %v66_v34  ;;  %v75_v53 = vadd.f32 %v74_v44, %v73_v35  ;;  %v82_v54 = vadd.f32 %v81_v45, %v80_v36  ;;  %v89_v55 = vadd.f32 %v88_v46, %v87_v37  ;;  %v141_v22 = vld [vmem:[%s449_s1 + $0x18] sm:$0xff]  ;;  %v138_v37 = vld [vmem:[%s449_s1] sm:$0xff] }
   0xd   :  { %305 = vmatprep.subr.mxu0 %v330_v0  ;;  %v96_v56 = vadd.f32 %v95_v47, %v94_v38  ;;  %v103_v57 = vadd.f32 %v102_v48, %v101_v39  ;;  %v55_v59 = vrot.slane %v54_v50, 2  ;;  %v62_v60 = vrot.slane %v61_v51, 2 }
   0xe   :  { %306 = vmatpush3.msra.mxu0 %v147_v31  ;;  %v69_v61 = vrot.slane %v68_v52, 2  ;;  %v76_v62 = vrot.slane %v75_v53, 2  ;;  %v83_v63 = vrot.slane %v82_v54, 2  ;;  %v90_v1 = vrot.slane %v89_v55, 2 }
   0xf   :  { %307 = vmatprep.subr.mxu0 %v330_v0  ;;  %v97_v2 = vrot.slane %v96_v56, 2  ;;  %v104_v3 = vrot.slane %v103_v57, 2  ;;  %v56_v5 = vadd.f32 %v55_v59, %v54_v50  ;;  %v63_v6 = vadd.f32 %v62_v60, %v61_v51 }
  0x10   :  { %308 = vmatpush3.msra.mxu0 %v146_v40  ;;  %v70_v7 = vadd.f32 %v69_v61, %v68_v52  ;;  %v77_v8 = vadd.f32 %v76_v62, %v75_v53  ;;  %v84_v9 = vadd.f32 %v83_v63, %v82_v54  ;;  %v91_v10 = vadd.f32 %v90_v1, %v89_v55 }
  0x11   :  { %309 = vmatprep.subr.mxu0 %v330_v0  ;;  %v98_v11 = vadd.f32 %v97_v2, %v96_v56  ;;  %v105_v12 = vadd.f32 %v104_v3, %v103_v57  ;;  %v57_v14 = vrot.slane %v56_v5, 1  ;;  %v64_v15 = vrot.slane %v63_v6, 1 }
  0x12   :  { %310 = vmatpush3.msra.mxu0 %v145_v49  ;;  %v71_v16 = vrot.slane %v70_v7, 1  ;;  %v78_v17 = vrot.slane %v77_v8, 1  ;;  %v85_v18 = vrot.slane %v84_v9, 1  ;;  %v92_v19 = vrot.slane %v91_v10, 1 }
  0x13   :  { %311 = vmatprep.subr.mxu0 %v330_v0  ;;  %v99_v20 = vrot.slane %v98_v11, 1  ;;  %v106_v21 = vrot.slane %v105_v12, 1  ;;  %v58_v23 = vadd.f32 %v57_v14, %v56_v5  ;;  %v65_v24 = vadd.f32 %v64_v15, %v63_v6 }
  0x14   :  { %312 = vmatpush3.msra.mxu0 %v144_v58  ;;  %v72_v25 = vadd.f32 %v71_v16, %v70_v7  ;;  %v79_v26 = vadd.f32 %v78_v17, %v77_v8  ;;  %v86_v27 = vadd.f32 %v85_v18, %v84_v9  ;;  %v93_v29 = vadd.f32 %v92_v19, %v91_v10 }
  0x15   :  { %313 = vmatprep.subr.mxu0 %v330_v0  ;;  %v117_v30 = vsel %vm116_vm1, %v65_v24, %v58_v23  ;;  %v100_v31 = vadd.f32 %v99_v20, %v98_v11  ;;  %v107_v34 = vadd.f32 %v106_v21, %v105_v12 }
  0x16   :  { %314 = vmatpush3.msra.mxu0 %v143_v4  ;;  %v119_v32 = vsel %vm118_vm2, %v72_v25, %v117_v30 }
  0x17   :  { %315 = vmatprep.subr.mxu0 %v330_v0  ;;  %v121_v35 = vsel %vm120_vm3, %v79_v26, %v119_v32 }
  0x18   :  { %316 = vmatpush3.msra.mxu0 %v142_v13  ;;  %v123_v36 = vsel %vm122_vm4, %v86_v27, %v121_v35 }
  0x19   :  { %317 = vmatprep.subr.mxu0 %v330_v0  ;;  %v125_v38 = vsel %vm124_vm5, %v93_v29, %v123_v36 }
  0x1a   :  { %318 = vmatpush3.msra.mxu0 %v141_v22  ;;  %v127_v39 = vsel %vm126_vm6, %v100_v31, %v125_v38 }
  0x1b   :  { %319 = vmatprep.subr.mxu0 %v330_v0  ;;  %v129_v40 = vsel %vm128_vm7, %v107_v34, %v127_v39 }
  0x1c   :  { %320 = vmatpush3.msra.mxu0 %v140_v28  ;;  %v137_v41 = vmul.f32 0.0625, %v129_v40 }
  0x1d   :  { %321 = vmatprep.subr.mxu0 %v330_v0 }
  0x1e   :  { %322 = vmatpush3.msra.mxu0 %v139_v33 }
  0x1f   :  { %323 = vmatprep.subr.mxu0 %v330_v0 }
  0x20   :  { %324 = vmatpush3.msra.mxu0 %v138_v37 }
  0x21   :  { %326 = vmatmul.mubr.f32.vlgmr.msra.gmra.mxu0 %v137_v41 }
  0xe1   :  { %v227_v43 = vpop.f32.mrf.mxu0 }
  0xe2   :  { %v228_v44 = vadd.f32 %v236_v42, %v227_v43 }
  0xe3   :  { %v327_v45 = vpop.f32.mrf.mxu0 }
  0xe4   :  { %231 = vst [vmem:[%s452_s3] sm:$0xff] %v228_v44 }

</bundles_post_ra>
